<compile_context>
chip_gen: v7x
topology: tpu7x:2x2x1
jax: 0.10.0
libtpu: 0.0.40
codegen_flags: <defaults>
</compile_context>

<pallas_src>
import jax
import jax.numpy as jnp
from jax.experimental import pallas as pl
from jax.experimental.pallas import tpu as pltpu


def _fused_kernel(gate_ref, w_ref, x_ref, o_ref):
    # gate_ref: (Cin, 1) f32, w_ref: (Cout, Cin) bf16, x_ref: (Cin, HW) f32
    g = jax.nn.sigmoid(gate_ref[...])                       # EUP, tiny (Cin,1)
    # Gate the activation (per-row scale), then feed the MXU in bf16.
    xg = (x_ref[...] * g).astype(jnp.bfloat16)               # (Cin, HW)
    # 1x1 conv == matmul on the MXU, f32 accumulation.
    o_ref[...] = jnp.dot(w_ref[...], xg,
                         preferred_element_type=jnp.float32).astype(o_ref.dtype)


def sigmoid_mul_conv1x1(x_nchw, gate_nc11, weight_bf16_oc_ic_1_1):
    """Conv2d(336,336,1,1,bias=False)(sigmoid(gate) * x), weight fed in bf16."""
    n, c, h, w = x_nchw.shape
    co = weight_bf16_oc_ic_1_1.shape[0]
    hw = h * w
    assert n == 1, "optimized NCHW-native path assumes batch size 1 (matches module spec)"

    # Reshape-only glue (no transposes, no extra HBM round trips).
    x_c_hw = x_nchw.reshape(c, hw)                       # (Cin, HW)  f32
    gate_c1 = gate_nc11.reshape(c, 1)                    # (Cin, 1)   f32
    w_co_ci = weight_bf16_oc_ic_1_1.reshape(co, c)       # (Cout, Cin) bf16

    out_co_hw = pl.pallas_call(
        _fused_kernel,
        out_shape=jax.ShapeDtypeStruct((co, hw), x_nchw.dtype),
        in_specs=[
            pl.BlockSpec((c, 1), lambda: (0, 0)),        # gate  (full array)
            pl.BlockSpec((co, c), lambda: (0, 0)),       # weight (Cout, Cin)
            pl.BlockSpec((c, hw), lambda: (0, 0)),       # x (Cin, HW)
        ],
        out_specs=pl.BlockSpec((co, hw), lambda: (0, 0)),
        compiler_params=pltpu.CompilerParams(
            # Allow XLA to fuse elementwise producers into the input feed.
            allow_input_fusion=[True, True, True],
        ),
        cost_estimate=pl.CostEstimate(
            flops=2 * hw * c * co,
            transcendentals=c,
            bytes_accessed=(c * 4            # gate  (f32)
                            + co * c * 2     # weight (bf16)
                            + c * hw * 4     # x      (f32)
                            + co * hw * 4),  # out    (f32)
        ),
    )(gate_c1, w_co_ci, x_c_hw)

    # Free reshape back to NCHW.
    return out_co_hw.reshape(n, co, h, w)


if __name__ == "__main__":
    key = jax.random.PRNGKey(0)
    k1, k2, k3 = jax.random.split(key, 3)

    N, C, H, W = 1, 336, 14, 14
    x399 = jax.random.normal(k1, (N, C, H, W), dtype=jnp.float32)   # feature map
    x403 = jax.random.normal(k2, (N, C, 1, 1), dtype=jnp.float32)   # SE gate
    # Conv2d(336, 336, 1, 1, bias=False) weight; keep it resident in bf16
    # (cast once at the producer, not inside the jitted wrapper).
    weight_f32 = jax.random.normal(k3, (C, C, 1, 1), dtype=jnp.float32) * 0.05
    weight_bf16 = weight_f32.astype(jnp.bfloat16)

    out = jax.jit(sigmoid_mul_conv1x1)(x399, x403, weight_bf16)
    jax.block_until_ready(out)
    assert out.shape == (N, C, H, W)

    # Tight check: reference built from the SAME bf16-rounded operands, f32 accumulation.
    gated = jax.nn.sigmoid(x403) * x399
    gated_bf16 = gated.astype(jnp.bfloat16).astype(jnp.float32)
    ref_matched = jnp.einsum(
        "oi,nihw->nohw",
        weight_bf16.astype(jnp.float32).reshape(C, C),
        gated_bf16,
        precision=jax.lax.Precision.HIGHEST,
    )
    assert jnp.allclose(out, ref_matched, atol=1e-3, rtol=1e-3)

    # Loose check: full-f32 module semantics (bf16 operand rounding allowed).
    ref_f32 = jnp.einsum(
        "oi,nihw->nohw",
        weight_f32.reshape(C, C),
        gated,
        precision=jax.lax.Precision.HIGHEST,
    )
    assert jnp.allclose(out, ref_f32, atol=3e-2, rtol=3e-2)

    print("KERNEL_OK")
</pallas_src>

<mosaic_0001>
module attributes {stable_mosaic.version = 11 : i64} {
  func.func @_fused_kernel(%arg0: memref<336x1xf32, #tpu.memory_space<vmem>>, %arg1: memref<336x336xbf16, #tpu.memory_space<vmem>>, %arg2: memref<336x196xf32, #tpu.memory_space<vmem>>, %arg3: memref<336x196xf32, #tpu.memory_space<vmem>>) attributes {dimension_semantics = [], scalar_prefetch = 0 : i64, scratch_operands = 0 : i64, tpu.core_type = #tpu.core_type<tc>} {
    %c0 = arith.constant 0 : index
    %c0_0 = arith.constant 0 : index
    %0 = vector.load %arg0[%c0, %c0_0] : memref<336x1xf32, #tpu.memory_space<vmem>>, vector<336x1xf32>
    %1 = arith.negf %0 : vector<336x1xf32>
    %2 = math.exp %1 : vector<336x1xf32>
    %cst = arith.constant 1.000000e+00 : f32
    %3 = vector.broadcast %cst : f32 to vector<336x1xf32>
    %4 = arith.addf %3, %2 : vector<336x1xf32>
    %5 = arith.divf %3, %4 : vector<336x1xf32>
    %c0_1 = arith.constant 0 : index
    %c0_2 = arith.constant 0 : index
    %6 = vector.load %arg2[%c0_1, %c0_2] : memref<336x196xf32, #tpu.memory_space<vmem>>, vector<336x196xf32>
    %7 = vector.broadcast %5 : vector<336x1xf32> to vector<336x196xf32>
    %8 = arith.mulf %6, %7 : vector<336x196xf32>
    %9 = arith.truncf %8 : vector<336x196xf32> to vector<336x196xbf16>
    %c0_3 = arith.constant 0 : index
    %c0_4 = arith.constant 0 : index
    %10 = vector.load %arg1[%c0_3, %c0_4] : memref<336x336xbf16, #tpu.memory_space<vmem>>, vector<336x336xbf16>
    %cst_5 = arith.constant dense<0.000000e+00> : vector<336x196xf32>
    %11 = tpu.matmul %10, %9, %cst_5 {dimension_numbers = #tpu.dot_dimension_numbers<[1], [0], [0], [1], [0, 0, 1, 1], [], []>} : vector<336x336xbf16>, vector<336x196xbf16>, vector<336x196xf32> -> vector<336x196xf32>
    %c0_6 = arith.constant 0 : index
    %c0_7 = arith.constant 0 : index
    %12 = vector.load %arg3[%c0_6, %c0_7] : memref<336x196xf32, #tpu.memory_space<vmem>>, vector<336x196xf32>
    tpu.vector_store %arg3[%c0_6, %c0_7], %11 {strides = array<i32>} : memref<336x196xf32, #tpu.memory_space<vmem>>, vector<336x196xf32>,
    return
  }
}

</mosaic_0001>

<bundles_post_ra>
// kernel: sigmoid_mul_conv1x1.2
= control target key start
LH: loop header
LB: loop body
LE: loop exit
PB: predicated region body
PF: predicated region fallthrough
CT: control target
= control target key end

     0   :  { %v3737_v3 = vmov 0   ;;  %vm2134_vm0 = vcmask 654336   ;;  %vm2685_vm1 = vcmask 556032   ;;  %s4743_s0 = inlined_call_operand.vmem [shape: f32[336,1], index: 0, kind: input, shape index: {}]   ;;  %s4744_s1 = inlined_call_operand.vmem [shape: f32[336,196], index: 1, kind: input, shape index: {}]   ;;  %s4745_s2 = inlined_call_operand.vmem [shape: bf16[336,336,1,1], index: 2, kind: input, shape index: {}]   ;;  %s4746_s3 = inlined_call_operand.vmem [shape: f32[336,196], index: 3, kind: output, shape index: {}]  }
   0x1   :  { %v1023_v0 = vld [vmem:[%s4743_s0 + $0x10] sm:$0xff]  ;;  %v1021_v1 = vld [vmem:[%s4743_s0] sm:$0xff]  ;;  %v1024_v2 = vld [vmem:[%s4743_s0 + $0x18] sm:$0xff]  ;;  %3482 = vset.pattern.permute.xlu1 %v3737_v3  ;;  %3481 = vset.pattern.permute.xlu0 %v3737_v3 }
   0x2   :  { %v2900_v4 = vmul.f32 -1.442695, %v1023_v0  ;;  %v2898_v5 = vmul.f32 -1.442695, %v1021_v1  ;;  %v2901_v6 = vmul.f32 -1.442695, %v1024_v2  ;;  %2473 = vmatprep.mubr.bf16.mxu0 %v3737_v3 }
   0x3   :  { %v1022_v7 = vld [vmem:[%s4743_s0 + $0x8] sm:$0xff]  ;;  %v1025_v9 = vld [vmem:[%s4743_s0 + $0x20] sm:$0xff]  ;;  %v1028_v13 = vld [vmem:[%s4743_s0 + $0x38] sm:$0xff] }
   0x4   :  { %v1026_v8 = vld [vmem:[%s4743_s0 + $0x28] sm:$0xff]  ;;  %3569 = vpow2.f32 %v2900_v4  ;;  %v2899_v10 = vmul.f32 -1.442695, %v1022_v7  ;;  %v2902_v12 = vmul.f32 -1.442695, %v1025_v9  ;;  %v1027_v14 = vld [vmem:[%s4743_s0 + $0x30] sm:$0xff] }
   0x5   :  { %v2903_v11 = vmul.f32 -1.442695, %v1026_v8  ;;  %3571 = vpow2.f32 %v2898_v5  ;;  %v1030_v15 = vld [vmem:[%s4743_s0 + $0x48] sm:$0xff]  ;;  %v2905_v16 = vmul.f32 -1.442695, %v1028_v13  ;;  %v1029_v18 = vld [vmem:[%s4743_s0 + $0x40] sm:$0xff] }
   0x6   :  { %3573 = vpow2.f32 %v2901_v6  ;;  %v2904_v17 = vmul.f32 -1.442695, %v1027_v14  ;;  %v1032_v19 = vld [vmem:[%s4743_s0 + $0x58] sm:$0xff]  ;;  %v2907_v20 = vmul.f32 -1.442695, %v1030_v15  ;;  %v1031_v21 = vld [vmem:[%s4743_s0 + $0x50] sm:$0xff] }
   0x7   :  { %3575 = vpow2.f32 %v2899_v10  ;;  %v2906_v22 = vmul.f32 -1.442695, %v1029_v18  ;;  %v1034_v23 = vld [vmem:[%s4743_s0 + $0x68] sm:$0xff]  ;;  %v2909_v24 = vmul.f32 -1.442695, %v1032_v19  ;;  %v1033_v44 = vld [vmem:[%s4743_s0 + $0x60] sm:$0xff] }
   0x8   :  { %3577 = vpow2.f32 %v2903_v11  ;;  %v2908_v25 = vmul.f32 -1.442695, %v1031_v21  ;;  %v2911_v26 = vmul.f32 -1.442695, %v1034_v23  ;;  %v1036_v45 = vld [vmem:[%s4743_s0 + $0x78] sm:$0xff]  ;;  %v1035_v48 = vld [vmem:[%s4743_s0 + $0x70] sm:$0xff] }
   0x9   :  { %3579 = vpow2.f32 %v2902_v12  ;;  %v1038_v49 = vld [vmem:[%s4743_s0 + $0x88] sm:$0xff]  ;;  %v1037_v52 = vld [vmem:[%s4743_s0 + $0x80] sm:$0xff]  ;;  %v1040_v53 = vld [vmem:[%s4743_s0 + $0x98] sm:$0xff]  ;;  %v2910_v56 = vmul.f32 -1.442695, %v1033_v44 }
   0xa   :  { %3581 = vpow2.f32 %v2905_v16  ;;  %v2913_v57 = vmul.f32 -1.442695, %v1036_v45  ;;  %v1039_v58 = vld [vmem:[%s4743_s0 + $0x90] sm:$0xff]  ;;  %v2912_v61 = vmul.f32 -1.442695, %v1035_v48  ;;  %v1042_v63 = vld [vmem:[%s4743_s0 + $0xa8] sm:$0xff] }
   0xb   :  { %3583 = vpow2.f32 %v2904_v17  ;;  %v2915_v62 = vmul.f32 -1.442695, %v1038_v49  ;;  %v2914_v2 = vmul.f32 -1.442695, %v1037_v52  ;;  %v2917_v4 = vmul.f32 -1.442695, %v1040_v53 }
   0xc   :  { %3585 = vpow2.f32 %v2907_v20  ;;  %v2916_v6 = vmul.f32 -1.442695, %v1039_v58  ;;  %v1041_v7 = vld [vmem:[%s4743_s0 + $0xa0] sm:$0xff]  ;;  %v2919_v9 = vmul.f32 -1.442695, %v1042_v63  ;;  %v1044_v10 = vld [vmem:[%s4743_s0 + $0xb8] sm:$0xff] }
   0xd   :  { %3587 = vpow2.f32 %v2906_v22  ;;  %v1043_v11 = vld [vmem:[%s4743_s0 + $0xb0] sm:$0xff]  ;;  %v2918_v16 = vmul.f32 -1.442695, %v1041_v7  ;;  %v1054_v17 = vld [vmem:[%s4743_s0 + $0x108] sm:$0xff]  ;;  %v2921_v19 = vmul.f32 -1.442695, %v1044_v10 }
   0xe   :  { %v3570_v27 = vpop.eup %3569  ;;  %3589 = vpow2.f32 %v2909_v24  ;;  %v2920_v20 = vmul.f32 -1.442695, %v1043_v11  ;;  %v2931_v23 = vmul.f32 -1.442695, %v1054_v17  ;;  %v1053_v24 = vld [vmem:[%s4743_s0 + $0x100] sm:$0xff]  ;;  %v1055_v45 = vld [vmem:[%s4743_s0 + $0x110] sm:$0xff] }
   0xf   :  { %v3572_v28 = vpop.eup %3571  ;;  %v1191_v29 = vadd.f32 1.0, %v3570_v27  ;;  %3591 = vpow2.f32 %v2908_v25  ;;  %v2932_v53 = vmul.f32 -1.442695, %v1055_v45  ;;  %v1050_v10 = vld [vmem:[%s4743_s0 + $0xe8] sm:$0xff]  ;;  %v1049_v11 = vld [vmem:[%s4743_s0 + $0xe0] sm:$0xff] }
  0x10   :  { %v3574_v30 = vpop.eup %3573  ;;  %v1189_v31 = vadd.f32 1.0, %v3572_v28  ;;  %3593 = vpow2.f32 %v2911_v26  ;;  %v2927_v17 = vmul.f32 -1.442695, %v1050_v10 }
  0x11   :  { %v3576_v32 = vpop.eup %3575  ;;  %3595 = vrcp.f32 %v1191_v29  ;;  %v1192_v33 = vadd.f32 1.0, %v3574_v30  ;;  %v2930_v29 = vmul.f32 -1.442695, %v1053_v24  ;;  %v1046_v30 = vld [vmem:[%s4743_s0 + $0xc8] sm:$0xff] }
  0x12   :  { %v3578_v34 = vpop.eup %3577  ;;  %3597 = vrcp.f32 %v1189_v31  ;;  %v1190_v35 = vadd.f32 1.0, %v3576_v32 }
  0x13   :  { %v3580_v36 = vpop.eup %3579  ;;  %3599 = vrcp.f32 %v1192_v33  ;;  %v1194_v37 = vadd.f32 1.0, %v3578_v34  ;;  %v1045_v33 = vld [vmem:[%s4743_s0 + $0xc0] sm:$0xff] }
  0x14   :  { %v3582_v38 = vpop.eup %3581  ;;  %3601 = vrcp.f32 %v1190_v35  ;;  %v1193_v39 = vadd.f32 1.0, %v3580_v36 }
  0x15   :  { %v3584_v40 = vpop.eup %3583  ;;  %3603 = vrcp.f32 %v1194_v37  ;;  %v1196_v41 = vadd.f32 1.0, %v3582_v38  ;;  %v2923_v38 = vmul.f32 -1.442695, %v1046_v30 }
  0x16   :  { %v3586_v42 = vpop.eup %3585  ;;  %3605 = vrcp.f32 %v1193_v39  ;;  %v1195_v43 = vadd.f32 1.0, %v3584_v40 }
  0x17   :  { %v3588_v46 = vpop.eup %3587  ;;  %3607 = vrcp.f32 %v1196_v41  ;;  %v1198_v47 = vadd.f32 1.0, %v3586_v42  ;;  %v2922_v41 = vmul.f32 -1.442695, %v1045_v33  ;;  %v1056_v42 = vld [vmem:[%s4743_s0 + $0x118] sm:$0xff] }
  0x18   :  { %v3590_v50 = vpop.eup %3589  ;;  %3609 = vrcp.f32 %v1195_v43  ;;  %v1197_v51 = vadd.f32 1.0, %v3588_v46 }
  0x19   :  { %v3592_v54 = vpop.eup %3591  ;;  %3611 = vrcp.f32 %v1198_v47  ;;  %v1200_v55 = vadd.f32 1.0, %v3590_v50  ;;  %v2933_v50 = vmul.f32 -1.442695, %v1056_v42 }
  0x1a   :  { %v3594_v59 = vpop.eup %3593  ;;  %3613 = vrcp.f32 %v1197_v51  ;;  %v1199_v60 = vadd.f32 1.0, %v3592_v54  ;;  %v1048_v54 = vld [vmem:[%s4743_s0 + $0xd8] sm:$0xff] }
  0x1b   :  { %v3596_v0 = vpop.eup %3595  ;;  %3615 = vrcp.f32 %v1200_v55  ;;  %v1202_v1 = vadd.f32 1.0, %v3594_v59  ;;  %v1047_v59 = vld [vmem:[%s4743_s0 + $0xd0] sm:$0xff] }
  0x1c   :  { %v3598_v5 = vpop.eup %3597  ;;  %1411 = vperm.xlu1 %3482, %v3596_v0   ;;  %3617 = vrcp.f32 %v1199_v60  ;;  %v1058_v0 = vld [vmem:[%s4743_s0 + $0x128] sm:$0xff] }
  0x1d   :  { %v3600_v8 = vpop.eup %3599  ;;  %1401 = vperm.xlu0 %3481, %v3598_v5   ;;  %3619 = vrcp.f32 %v1202_v1  ;;  %v1057_v1 = vld [vmem:[%s4743_s0 + $0x120] sm:$0xff] }
  0x1e   :  { %v3602_v12 = vpop.eup %3601  ;;  %3621 = vpow2.f32 %v2910_v56 }
  0x1f   :  { %v3604_v13 = vpop.eup %3603  ;;  %3623 = vpow2.f32 %v2913_v57 }
  0x20   :  { %v3606_v14 = vpop.eup %3605  ;;  %1416 = vperm.xlu1 %3482, %v3600_v8   ;;  %3625 = vpow2.f32 %v2912_v61  ;;  %v2935_v8 = vmul.f32 -1.442695, %v1058_v0 }
  0x21   :  { %v3608_v15 = vpop.eup %3607  ;;  %1406 = vperm.xlu0 %3481, %v3602_v12   ;;  %3627 = vpow2.f32 %v2915_v62  ;;  %v2925_v62 = vmul.f32 -1.442695, %v1048_v54 }
  0x22   :  { %v3610_v18 = vpop.eup %3609  ;;  %3629 = vpow2.f32 %v2914_v2 }
  0x23   :  { %v3612_v21 = vpop.eup %3611  ;;  %3631 = vpow2.f32 %v2917_v4  ;;  %v2924_v4 = vmul.f32 -1.442695, %v1047_v59 }
  0x24   :  { %v3614_v22 = vpop.eup %3613  ;;  %1426 = vperm.xlu1 %3482, %v3604_v13   ;;  %3633 = vpow2.f32 %v2916_v6  ;;  %v1060_v13 = vld [vmem:[%s4743_s0 + $0x138] sm:$0xff] }
  0x25   :  { %v3616_v25 = vpop.eup %3615  ;;  %1421 = vperm.xlu0 %3481, %v3606_v14   ;;  %3635 = vpow2.f32 %v2919_v9  ;;  %v2934_v9 = vmul.f32 -1.442695, %v1057_v1 }
  0x26   :  { %v3618_v26 = vpop.eup %3617  ;;  %3637 = vpow2.f32 %v2918_v16 }
  0x27   :  { %v3620_v27 = vpop.eup %3619  ;;  %3639 = vpow2.f32 %v2921_v19  ;;  %v2937_v19 = vmul.f32 -1.442695, %v1060_v13 }
  0x28   :  { %v3622_v28 = vpop.eup %3621  ;;  %1436 = vperm.xlu1 %3482, %v3608_v15   ;;  %3641 = vpow2.f32 %v2920_v20 }
  0x29   :  { %v3624_v31 = vpop.eup %3623  ;;  %1431 = vperm.xlu0 %3481, %v3610_v18   ;;  %v1201_v32 = vadd.f32 1.0, %v3622_v28  ;;  %3643 = vpow2.f32 %v2931_v23  ;;  %v2926_v18 = vmul.f32 -1.442695, %v1049_v11  ;;  %v1052_v28 = vld [vmem:[%s4743_s0 + $0xf8] sm:$0xff] }
  0x2a   :  { %v3626_v34 = vpop.eup %3625  ;;  %v1204_v35 = vadd.f32 1.0, %v3624_v31 }
  0x2b   :  { %v3628_v36 = vpop.eup %3627  ;;  %3645 = vrcp.f32 %v1201_v32  ;;  %v1203_v37 = vadd.f32 1.0, %v3626_v34  ;;  %v2929_v34 = vmul.f32 -1.442695, %v1052_v28  ;;  %v3905_v28 = vld [vmem:[%s4745_s2 + $0x18] sm:$0xff]  }
  0x2c   :  { %v3630_v39 = vpop.eup %3629  ;;  %1446 = vperm.xlu1 %3482, %v3612_v21   ;;  %3647 = vrcp.f32 %v1204_v35  ;;  %v1206_v40 = vadd.f32 1.0, %v3628_v36 }
  0x2d   :  { %v3632_v43 = vpop.eup %3631  ;;  %1441 = vperm.xlu0 %3481, %v3614_v22   ;;  %3649 = vrcp.f32 %v1203_v37  ;;  %v1205_v44 = vadd.f32 1.0, %v3630_v39  ;;  %v1059_v22 = vld [vmem:[%s4743_s0 + $0x130] sm:$0xff] }
  0x2e   :  { %v3634_v46 = vpop.eup %3633  ;;  %v1208_v47 = vadd.f32 1.0, %v3632_v43  ;;  %3651 = vpow2.f32 %v2930_v29 }
  0x2f   :  { %v3636_v48 = vpop.eup %3635  ;;  %3653 = vrcp.f32 %v1206_v40  ;;  %v1207_v49 = vadd.f32 1.0, %v3634_v46 }
  0x30   :  { %v3638_v51 = vpop.eup %3637  ;;  %1456 = vperm.xlu1 %3482, %v3616_v25   ;;  %3655 = vrcp.f32 %v1205_v44  ;;  %v1210_v52 = vadd.f32 1.0, %v3636_v48 }
  0x31   :  { %v3640_v55 = vpop.eup %3639  ;;  %1451 = vperm.xlu0 %3481, %v3618_v26   ;;  %3657 = vrcp.f32 %v1208_v47  ;;  %v1209_v56 = vadd.f32 1.0, %v3638_v51  ;;  %v2936_v26 = vmul.f32 -1.442695, %v1059_v22  ;;  %v1051_v47 = vld [vmem:[%s4743_s0 + $0xf0] sm:$0xff]  ;;  %v14_v22 = vld [vmem:[%s4745_s2] sm:$0xff]  }
  0x32   :  { %v3642_v57 = vpop.eup %3641  ;;  %3659 = vrcp.f32 %v1207_v49  ;;  %v1212_v58 = vadd.f32 1.0, %v3640_v55  ;;  %v2928_v55 = vmul.f32 -1.442695, %v1051_v47  ;;  %19 = vst [vmem:[#allocation2] sm:$0xff] %v14_v22   ;;  %v1322_v47 = vld [vmem:[%s4744_s1 + $0x38] sm:$0xff] }
  0x33   :  { %v3644_v60 = vpop.eup %3643  ;;  %3661 = vrcp.f32 %v1210_v52  ;;  %v1211_v61 = vadd.f32 1.0, %v3642_v57 }
  0x34   :  { %1466 = vperm.xlu1 %3482, %v3620_v27   ;;  %3663 = vrcp.f32 %v1209_v56  ;;  %v1222_v63 = vadd.f32 1.0, %v3644_v60 }
  0x35   :  { %v3646_v2 = vpop.eup %3645  ;;  %3665 = vrcp.f32 %v1212_v58 }
  0x36   :  { %v3648_v5 = vpop.eup %3647  ;;  %1461 = vperm.xlu0 %3481, %v3646_v2   ;;  %3667 = vrcp.f32 %v1211_v61 }
  0x37   :  { %v3650_v6 = vpop.eup %3649  ;;  %3669 = vrcp.f32 %v1222_v63 }
  0x38   :  { %v3652_v7 = vpop.eup %3651  ;;  %1476 = vperm.xlu1 %3482, %v3648_v5   ;;  %3671 = vpow2.f32 %v2923_v38 }
  0x39   :  { %v3654_v12 = vpop.eup %3653  ;;  %3673 = vpow2.f32 %v2922_v41  ;;  %v1221_v21 = vadd.f32 1.0, %v3652_v7 }
  0x3a   :  { %v3656_v14 = vpop.eup %3655  ;;  %1471 = vperm.xlu0 %3481, %v3650_v6   ;;  %3675 = vpow2.f32 %v2933_v50  ;;  %v1062_v50 = vld [vmem:[%s4743_s0 + $0x148] sm:$0xff] }
  0x3b   :  { %v3658_v15 = vpop.eup %3657  ;;  %3677 = vpow2.f32 %v2932_v53  ;;  %v1061_v53 = vld [vmem:[%s4743_s0 + $0x140] sm:$0xff]  ;;  %v2939_v57 = vmul.f32 -1.442695, %v1062_v50  ;;  %v3975_v50 = vld [vmem:[%s4745_s2 + $0x90] sm:$0xff]  }
  0x3c   :  { %v3660_v16 = vpop.eup %3659  ;;  %1486 = vperm.xlu1 %3482, %v3654_v12   ;;  %3679 = vpow2.f32 %v2925_v62  ;;  %v2938_v61 = vmul.f32 -1.442695, %v1061_v53 }
  0x3d   :  { %v3662_v20 = vpop.eup %3661  ;;  %3681 = vpow2.f32 %v2924_v4 }
  0x3e   :  { %v3664_v23 = vpop.eup %3663  ;;  %1481 = vperm.xlu0 %3481, %v3656_v14   ;;  %3683 = vpow2.f32 %v2935_v8 }
  0x3f   :  { %v3666_v24 = vpop.eup %3665  ;;  %3685 = vpow2.f32 %v2934_v9 }
  0x40   :  { %v3668_v25 = vpop.eup %3667  ;;  %1496 = vperm.xlu1 %3482, %v3658_v15   ;;  %3687 = vpow2.f32 %v2927_v17 }
  0x41   :  { %v3670_v27 = vpop.eup %3669  ;;  %3689 = vrcp.f32 %v1221_v21 }
  0x42   :  { %v3672_v29 = vpop.eup %3671  ;;  %1491 = vperm.xlu0 %3481, %v3660_v16   ;;  %3691 = vpow2.f32 %v2926_v18 }
  0x43   :  { %v3674_v30 = vpop.eup %3673  ;;  %v1214_v31 = vadd.f32 1.0, %v3672_v29  ;;  %3693 = vpow2.f32 %v2937_v19  ;;  %v3483_v19 = vld [vmem:[%s4745_s2 + $0x8] sm:$0xff]   ;;  %v3494_v29 = vld [vmem:[%s4745_s2 + $0x38] sm:$0xff]  }
  0x44   :  { %v3676_v32 = vpop.eup %3675  ;;  %1506 = vperm.xlu1 %3482, %v3662_v20   ;;  %v1213_v33 = vadd.f32 1.0, %v3674_v30  ;;  %3695 = vpow2.f32 %v2936_v26  ;;  %v3484_v20 = vld [vmem:[%s4745_s2 + $0x10] sm:$0xff]   ;;  %3028 = vst [vmem:[#allocation2 + $0x8] sm:$0xff] %v3483_v19   ;;  %v3491_v26 = vld [vmem:[%s4745_s2 + $0x28] sm:$0xff]   ;;  %v3495_v30 = vld [vmem:[%s4745_s2 + $0x40] sm:$0xff]  }
  0x45   :  { %v3678_v35 = vpop.eup %3677  ;;  %3697 = vrcp.f32 %v1214_v31  ;;  %v1224_v36 = vadd.f32 1.0, %v3676_v32  ;;  %3033 = vst [vmem:[#allocation2 + $0x10] sm:$0xff] %v3484_v20   ;;  %3048 = vst [vmem:[#allocation2 + $0x28] sm:$0xff] %v3491_v26   ;;  %v3916_v31 = vld [vmem:[%s4745_s2 + $0x30] sm:$0xff]  }
  0x46   :  { %v3680_v37 = vpop.eup %3679  ;;  %1501 = vperm.xlu0 %3481, %v3664_v23   ;;  %3699 = vrcp.f32 %v1213_v33  ;;  %v1223_v38 = vadd.f32 1.0, %v3678_v35  ;;  %3058 = vst [vmem:[#allocation2 + $0x38] sm:$0xff] %v3494_v29   ;;  %3063 = vst [vmem:[#allocation2 + $0x40] sm:$0xff] %v3495_v30   ;;  %v3498_v32 = vld [vmem:[%s4745_s2 + $0x50] sm:$0xff]   ;;  %v3499_v33 = vld [vmem:[%s4745_s2 + $0x58] sm:$0xff]  }
  0x47   :  { %v3682_v39 = vpop.eup %3681  ;;  %3701 = vrcp.f32 %v1224_v36  ;;  %v1216_v40 = vadd.f32 1.0, %v3680_v37  ;;  %3073 = vst [vmem:[#allocation2 + $0x50] sm:$0xff] %v3498_v32   ;;  %3078 = vst [vmem:[#allocation2 + $0x58] sm:$0xff] %v3499_v33   ;;  %v3502_v35 = vld [vmem:[%s4745_s2 + $0x68] sm:$0xff]   ;;  %v3503_v36 = vld [vmem:[%s4745_s2 + $0x70] sm:$0xff]  }
  0x48   :  { %v3684_v41 = vpop.eup %3683  ;;  %1516 = vperm.xlu1 %3482, %v3666_v24   ;;  %3703 = vpow2.f32 %v2929_v34  ;;  %v1215_v43 = vadd.f32 1.0, %v3682_v39  ;;  %v3927_v34 = vld [vmem:[%s4745_s2 + $0x48] sm:$0xff]   ;;  %3088 = vst [vmem:[#allocation2 + $0x68] sm:$0xff] %v3502_v35   ;;  %3093 = vst [vmem:[#allocation2 + $0x70] sm:$0xff] %v3503_v36   ;;  %v3938_v37 = vld [vmem:[%s4745_s2 + $0x60] sm:$0xff]  }
  0x49   :  { %v3686_v42 = vpop.eup %3685  ;;  %3705 = vrcp.f32 %v1223_v38  ;;  %v1226_v46 = vadd.f32 1.0, %v3684_v41  ;;  %v3506_v38 = vld [vmem:[%s4745_s2 + $0x80] sm:$0xff]   ;;  %v3507_v39 = vld [vmem:[%s4745_s2 + $0x88] sm:$0xff]   ;;  %v3510_v41 = vld [vmem:[%s4745_s2 + $0x98] sm:$0xff]  }
  0x4a   :  { %v3688_v44 = vpop.eup %3687  ;;  %1511 = vperm.xlu0 %3481, %v3668_v25   ;;  %3707 = vrcp.f32 %v1216_v40  ;;  %v1225_v49 = vadd.f32 1.0, %v3686_v42  ;;  %v3490_v25 = vld [vmem:[%s4745_s2 + $0x20] sm:$0xff]   ;;  %3103 = vst [vmem:[#allocation2 + $0x80] sm:$0xff] %v3506_v38   ;;  %3108 = vst [vmem:[#allocation2 + $0x88] sm:$0xff] %v3507_v39   ;;  %v3949_v40 = vld [vmem:[%s4745_s2 + $0x78] sm:$0xff]  }
  0x4b   :  { %v3690_v45 = vpop.eup %3689  ;;  %3709 = vrcp.f32 %v1215_v43  ;;  %v1218_v52 = vadd.f32 1.0, %v3688_v44  ;;  %3043 = vst [vmem:[#allocation2 + $0x20] sm:$0xff] %v3490_v25   ;;  %v3511_v42 = vld [vmem:[%s4745_s2 + $0xa0] sm:$0xff]   ;;  %3118 = vst [vmem:[#allocation2 + $0x98] sm:$0xff] %v3510_v41   ;;  %v1329_v25 = vld [vmem:[%s4744_s1 + $0x70] sm:$0xff] }
  0x4c   :  { %v3692_v48 = vpop.eup %3691  ;;  %1566 = vperm.xlu1 %3482, %v3670_v27   ;;  %3711 = vrcp.f32 %v1226_v46  ;;  %v3487_v27 = vld [vmem:[#allocation2 + $0x4] ss:$12 sps:$4 sm:$0xff]   ;;  %3123 = vst [vmem:[#allocation2 + $0xa0] sm:$0xff] %v3511_v42   ;;  %v1334_v30 = vld [vmem:[%s4744_s1 + $0x98] sm:$0xff]  ;;  %v1332_v32 = vld [vmem:[%s4744_s1 + $0x88] sm:$0xff] }
  0x4d   :  { %v3694_v51 = vpop.eup %3693  ;;  %3713 = vrcp.f32 %v1225_v49  ;;  %v1217_v59 = vadd.f32 1.0, %v3692_v48  ;;  %2230 = vmatprep.mubr.bf16.mxu1 %v3487_v27  ;;  %v1315_v44 = vld [vmem:[%s4744_s1] sm:$0xff]  ;;  %v1317_v48 = vld [vmem:[%s4744_s1 + $0x10] sm:$0xff]  ;;  %v1318_v49 = vld [vmem:[%s4744_s1 + $0x18] sm:$0xff] }
  0x4e   :  { %v3696_v54 = vpop.eup %3695  ;;  %1561 = vperm.xlu0 %3481, %v3690_v45   ;;  %v1228_v60 = vadd.f32 1.0, %v3694_v51  ;;  %3715 = vrcp.f32 %v1218_v52  ;;  %v1316_v45 = vld [vmem:[%s4744_s1 + $0x8] sm:$0xff]  ;;  %v3514_v51 = vld [vmem:[%s4745_s2 + $0xb0] sm:$0xff]   ;;  %v3515_v52 = vld [vmem:[%s4745_s2 + $0xb8] sm:$0xff]  }
  0x4f   :  { %v3698_v56 = vpop.eup %3697  ;;  %3717 = vpow2.f32 %v2928_v55  ;;  %v1227_v2 = vadd.f32 1.0, %v3696_v54  ;;  %v1320_v54 = vld [vmem:[%s4744_s1 + $0x28] sm:$0xff]  ;;  %3133 = vst [vmem:[#allocation2 + $0xb0] sm:$0xff] %v3514_v51   ;;  %3138 = vst [vmem:[#allocation2 + $0xb8] sm:$0xff] %v3515_v52   ;;  %v1327_v27 = vld [vmem:[%s4744_s1 + $0x60] sm:$0xff] }
  0x50   :  { %v3700_v58 = vpop.eup %3699  ;;  %1526 = vperm.xlu1 %3482, %v3698_v56   ;;  %3719 = vpow2.f32 %v2939_v57  ;;  %v1333_v39 = vld [vmem:[%s4744_s1 + $0x90] sm:$0xff]  ;;  %v3523_v51 = vld [vmem:[%s4745_s2 + $0xe8] sm:$0xff]  }
  0x51   :  { %v3702_v62 = vpop.eup %3701  ;;  %3721 = vpow2.f32 %v2938_v61  ;;  %3168 = vst [vmem:[#allocation2 + $0xe8] sm:$0xff] %v3523_v51   ;;  %v1352_v51 = vld [vmem:[%s4744_s1 + $0x128] sm:$0xff] }
  0x52   :  { %v3704_v63 = vpop.eup %3703  ;;  %1521 = vperm.xlu0 %3481, %v3700_v58   ;;  %3723 = vrcp.f32 %v1217_v59  ;;  %v1321_v58 = vld [vmem:[%s4744_s1 + $0x30] sm:$0xff] }
  0x53   :  { %v3706_v0 = vpop.eup %3705  ;;  %v1220_v4 = vadd.f32 1.0, %v3704_v63  ;;  %3725 = vrcp.f32 %v1228_v60  ;;  %v1324_v63 = vld [vmem:[%s4744_s1 + $0x48] sm:$0xff] }
  0x54   :  { %1576 = vperm.xlu1 %3482, %v3702_v62   ;;  %v3708_v1 = vpop.eup %3707  ;;  %3727 = vrcp.f32 %v1227_v2  ;;  %v1326_v62 = vld [vmem:[%s4744_s1 + $0x58] sm:$0xff] }
  0x55   :  { %v3710_v5 = vpop.eup %3709  ;;  %3729 = vrcp.f32 %v1220_v4 }
  0x56   :  { %1571 = vperm.xlu0 %3481, %v3706_v0   ;;  %v3712_v6 = vpop.eup %3711  ;;  %v1319_v0 = vld [vmem:[%s4744_s1 + $0x20] sm:$0xff] }
  0x57   :  { %v3714_v7 = vpop.eup %3713 }
  0x58   :  { %1536 = vperm.xlu1 %3482, %v3708_v1   ;;  %v3716_v8 = vpop.eup %3715 }
  0x59   :  { %v3718_v9 = vpop.eup %3717 }
  0x5a   :  { %1531 = vperm.xlu0 %3481, %v3710_v5   ;;  %v3720_v10 = vpop.eup %3719  ;;  %v1219_v11 = vadd.f32 1.0, %v3718_v9 }
  0x5b   :  { %v3722_v12 = vpop.eup %3721  ;;  %v1230_v13 = vadd.f32 1.0, %v3720_v10 }
  0x5c   :  { %1586 = vperm.xlu1 %3482, %v3712_v6   ;;  %v3724_v14 = vpop.eup %3723  ;;  %3731 = vrcp.f32 %v1219_v11  ;;  %v1229_v15 = vadd.f32 1.0, %v3722_v12  ;;  %v1323_v11 = vld [vmem:[%s4744_s1 + $0x40] sm:$0xff] }
  0x5d   :  { %3733 = vrcp.f32 %v1230_v13  ;;  %v3726_v16 = vpop.eup %3725  ;;  %v1330_v13 = vld [vmem:[%s4744_s1 + $0x78] sm:$0xff] }
  0x5e   :  { %1581 = vperm.xlu0 %3481, %v3714_v7   ;;  %3735 = vrcp.f32 %v1229_v15  ;;  %v3728_v17 = vpop.eup %3727  ;;  %v1325_v7 = vld [vmem:[%s4744_s1 + $0x50] sm:$0xff] }
  0x5f   :  { %v3730_v18 = vpop.eup %3729 }
  0x60   :  { %1546 = vperm.xlu1 %3482, %v3716_v8  }
  0x62   :  { %1541 = vperm.xlu0 %3481, %v3724_v14   ;;  %v1328_v14 = vld [vmem:[%s4744_s1 + $0x68] sm:$0xff] }
  0x64   :  { %1596 = vperm.xlu1 %3482, %v3726_v16   ;;  %v4013_v16 = vld [vmem:[%s4745_s2 + $0xa8] sm:$0xff]  }
  0x66   :  { %1591 = vperm.xlu0 %3481, %v3728_v17   ;;  %v3732_v21 = vpop.eup %3731  ;;  %v3518_v17 = vld [vmem:[%s4745_s2 + $0xc8] sm:$0xff]  }
  0x67   :  { %v3734_v23 = vpop.eup %3733  ;;  %3148 = vst [vmem:[#allocation2 + $0xc8] sm:$0xff] %v3518_v17   ;;  %v1344_v17 = vld [vmem:[%s4744_s1 + $0xe8] sm:$0xff] }
  0x68   :  { %1556 = vperm.xlu1 %3482, %v3730_v18   ;;  %v3736_v24 = vpop.eup %3735  ;;  %v3519_v18 = vld [vmem:[%s4745_s2 + $0xd0] sm:$0xff]  }
  0x69   :  { %3153 = vst [vmem:[#allocation2 + $0xd0] sm:$0xff] %v3519_v18  }
  0x6a   :  { %1551 = vperm.xlu0 %3481, %v3732_v21  }
  0x6c   :  { %1606 = vperm.xlu1 %3482, %v3734_v23  }
  0x6e   :  { %1601 = vperm.xlu0 %3481, %v3736_v24  }
  0x9b   :  { %v1412_v43 = vpop.permute.xlu1 %1411 }
  0x9c   :  { %v1402_v46 = vpop.permute.xlu0 %1401  ;;  %v1614_v1 = vmul.f32 %v1412_v43, %v1320_v54  ;;  %v1613_v15 = vmul.f32 %v1412_v43, %v1319_v0  ;;  %v1340_v0 = vld [vmem:[%s4744_s1 + $0xc8] sm:$0xff] }
  0x9d   :  { %v1609_v55 = vmul.f32 %v1402_v46, %v1315_v44  ;;  %v1610_v57 = vmul.f32 %v1402_v46, %v1316_v45  ;;  %v1331_v44 = vld [vmem:[%s4744_s1 + $0x80] sm:$0xff]  ;;  %v1338_v46 = vld [vmem:[%s4744_s1 + $0xb8] sm:$0xff] }
  0x9f   :  { %v1417_v53 = vpop.permute.xlu1 %1416 }
  0xa0   :  { %v1407_v56 = vpop.permute.xlu0 %1406  ;;  %v1616_v59 = vmul.f32 %v1417_v53, %v1322_v47  ;;  %v1615_v6 = vmul.f32 %v1417_v53, %v1321_v58  ;;  %v1336_v47 = vld [vmem:[%s4744_s1 + $0xa8] sm:$0xff]  ;;  %v1337_v58 = vld [vmem:[%s4744_s1 + $0xb0] sm:$0xff] }
  0xa1   :  { %v1611_v60 = vmul.f32 %v1407_v56, %v1317_v48  ;;  %v1612_v61 = vmul.f32 %v1407_v56, %v1318_v49  ;;  %v4048_v48 = vld [vmem:[%s4745_s2 + $0xc0] sm:$0xff]  }
  0xa2   :  { %v1696_v9 = vpack.c.bf16 %v1616_v59, %v1614_v1  ;;  %v1695_v20 = vpack.c.bf16 %v1615_v6, %v1613_v15  ;;  %v3522_v49 = vld [vmem:[%s4745_s2 + $0xe0] sm:$0xff]   ;;  %v1341_v6 = vld [vmem:[%s4744_s1 + $0xd0] sm:$0xff] }
  0xa3   :  { %v1427_v2 = vpop.permute.xlu1 %1426  ;;  %v1694_v4 = vpack.c.bf16 %v1612_v61, %v1610_v57  ;;  %v1693_v5 = vpack.c.bf16 %v1611_v60, %v1609_v55  ;;  %3163 = vst [vmem:[#allocation2 + $0xe0] sm:$0xff] %v3522_v49   ;;  %v1335_v60 = vld [vmem:[%s4744_s1 + $0xa0] sm:$0xff] }
  0xa4   :  { %v1422_v8 = vpop.permute.xlu0 %1421  ;;  %v1620_v10 = vmul.f32 %v1427_v2, %v1326_v62  ;;  %v1619_v21 = vmul.f32 %v1427_v2, %v1325_v7  ;;  %v1342_v62 = vld [vmem:[%s4744_s1 + $0xd8] sm:$0xff] }
  0xa5   :  { %v1618_v12 = vmul.f32 %v1422_v8, %v1324_v63  ;;  %2198 = vmatprep.subr.bf16.mxu1 %v1694_v4  ;;  %v1617_v22 = vmul.f32 %v1422_v8, %v1323_v11  ;;  %v1339_v8 = vld [vmem:[%s4744_s1 + $0xc0] sm:$0xff] }
  0xa6   :  { %2199 = vmatpush1.bf16.msra.mxu1 %v1693_v5 }
  0xa7   :  { %2200 = vmatprep.subr.bf16.mxu1 %v1696_v9  ;;  %v1437_v19 = vpop.permute.xlu1 %1436  ;;  %v1698_v24 = vpack.c.bf16 %v1620_v10, %v1618_v12  ;;  %v1697_v35 = vpack.c.bf16 %v1619_v21, %v1617_v22  ;;  %v1346_v10 = vld [vmem:[%s4744_s1 + $0xf8] sm:$0xff]  ;;  %v1345_v22 = vld [vmem:[%s4744_s1 + $0xf0] sm:$0xff] }
  0xa8   :  { %v1432_v23 = vpop.permute.xlu0 %1431  ;;  %v1624_v26 = vmul.f32 %v1437_v19, %v1330_v13  ;;  %v1623_v36 = vmul.f32 %v1437_v19, %v1329_v25  ;;  %v4080_v12 = vld [vmem:[%s4745_s2 + $0xd8] sm:$0xff]  }
  0xa9   :  { %v1622_v29 = vmul.f32 %v1432_v23, %v1328_v14  ;;  %v1621_v38 = vmul.f32 %v1432_v23, %v1327_v27  ;;  %v3526_v13 = vld [vmem:[%s4745_s2 + $0xf8] sm:$0xff]   ;;  %v3527_v14 = vld [vmem:[%s4745_s2 + $0x100] sm:$0xff]  }
  0xaa   :  { %2201 = vmatpush1.bf16.msra.mxu1 %v1695_v20  ;;  %3178 = vst [vmem:[#allocation2 + $0xf8] sm:$0xff] %v3526_v13   ;;  %3183 = vst [vmem:[#allocation2 + $0x100] sm:$0xff] %v3527_v14   ;;  %v1350_v27 = vld [vmem:[%s4744_s1 + $0x118] sm:$0xff]  ;;  %v3534_v13 = vld [vmem:[%s4745_s2 + $0x128] sm:$0xff]  }
  0xab   :  { %2202 = vmatprep.subr.bf16.mxu1 %v1698_v24  ;;  %v1447_v33 = vpop.permute.xlu1 %1446  ;;  %v1700_v42 = vpack.c.bf16 %v1624_v26, %v1622_v29  ;;  %v1699_v53 = vpack.c.bf16 %v1623_v36, %v1621_v38  ;;  %v1343_v24 = vld [vmem:[%s4744_s1 + $0xe0] sm:$0xff]  ;;  %v1349_v38 = vld [vmem:[%s4744_s1 + $0x110] sm:$0xff]  ;;  %3208 = vst [vmem:[#allocation2 + $0x128] sm:$0xff] %v3534_v13  }
  0xac   :  { %v1442_v41 = vpop.permute.xlu0 %1441  ;;  %v1628_v43 = vmul.f32 %v1447_v33, %v1334_v30  ;;  %v1627_v54 = vmul.f32 %v1447_v33, %v1333_v39  ;;  %v1348_v30 = vld [vmem:[%s4744_s1 + $0x108] sm:$0xff]  ;;  %v3535_v14 = vld [vmem:[%s4745_s2 + $0x130] sm:$0xff]  }
  0xad   :  { %v1626_v45 = vmul.f32 %v1442_v41, %v1332_v32  ;;  %v1625_v55 = vmul.f32 %v1442_v41, %v1331_v44  ;;  %v1347_v41 = vld [vmem:[%s4744_s1 + $0x100] sm:$0xff]  ;;  %3213 = vst [vmem:[#allocation2 + $0x130] sm:$0xff] %v3535_v14   ;;  %v1369_v14 = vld [vmem:[%s4744_s1 + $0x1b0] sm:$0xff] }
  0xae   :  { %2203 = vmatpush1.bf16.msra.mxu1 %v1697_v35 }
  0xaf   :  { %2204 = vmatprep.subr.bf16.mxu1 %v1700_v42  ;;  %v1457_v52 = vpop.permute.xlu1 %1456  ;;  %v1702_v57 = vpack.c.bf16 %v1628_v43, %v1626_v45  ;;  %v1701_v1 = vpack.c.bf16 %v1627_v54, %v1625_v55  ;;  %v1354_v43 = vld [vmem:[%s4744_s1 + $0x138] sm:$0xff]  ;;  %v4115_v45 = vld [vmem:[%s4745_s2 + $0xf0] sm:$0xff]  }
  0xb0   :  { %v1452_v56 = vpop.permute.xlu0 %1451  ;;  %v1632_v59 = vmul.f32 %v1457_v52, %v1338_v46  ;;  %v1631_v2 = vmul.f32 %v1457_v52, %v1337_v58  ;;  %v3530_v46 = vld [vmem:[%s4745_s2 + $0x110] sm:$0xff]   ;;  %v1351_v58 = vld [vmem:[%s4744_s1 + $0x120] sm:$0xff] }
  0xb1   :  { %v1630_v61 = vmul.f32 %v1452_v56, %v1336_v47  ;;  %v1629_v4 = vmul.f32 %v1452_v56, %v1335_v60  ;;  %v3531_v47 = vld [vmem:[%s4745_s2 + $0x118] sm:$0xff]   ;;  %3193 = vst [vmem:[#allocation2 + $0x110] sm:$0xff] %v3530_v46   ;;  %v1353_v56 = vld [vmem:[%s4744_s1 + $0x130] sm:$0xff] }
  0xb2   :  { %2205 = vmatpush1.bf16.msra.mxu1 %v1699_v53  ;;  %3198 = vst [vmem:[#allocation2 + $0x118] sm:$0xff] %v3531_v47   ;;  %v1366_v46 = vld [vmem:[%s4744_s1 + $0x198] sm:$0xff]  ;;  %v1363_v47 = vld [vmem:[%s4744_s1 + $0x180] sm:$0xff] }
  0xb3   :  { %2206 = vmatprep.subr.bf16.mxu1 %v1702_v57  ;;  %v1467_v63 = vpop.permute.xlu1 %1466  ;;  %v1704_v5 = vpack.c.bf16 %v1632_v59, %v1630_v61  ;;  %v1703_v18 = vpack.c.bf16 %v1631_v2, %v1629_v4  ;;  %v1358_v61 = vld [vmem:[%s4744_s1 + $0x158] sm:$0xff] }
  0xb4   :  { %v1636_v7 = vmul.f32 %v1467_v63, %v1342_v62  ;;  %v1635_v19 = vmul.f32 %v1467_v63, %v1341_v6  ;;  %v1356_v63 = vld [vmem:[%s4744_s1 + $0x148] sm:$0xff] }
  0xb5   :  { %v1462_v9 = vpop.permute.xlu0 %1461 }
  0xb6   :  { %v1634_v11 = vmul.f32 %v1462_v9, %v1340_v0  ;;  %2207 = vmatpush1.bf16.msra.mxu1 %v1701_v1  ;;  %v1633_v20 = vmul.f32 %v1462_v9, %v1339_v8  ;;  %v1362_v9 = vld [vmem:[%s4744_s1 + $0x178] sm:$0xff] }
  0xb7   :  { %2208 = vmatprep.subr.bf16.mxu1 %v1704_v5  ;;  %v1477_v15 = vpop.permute.xlu1 %1476  ;;  %v1357_v5 = vld [vmem:[%s4744_s1 + $0x150] sm:$0xff] }
  0xb8   :  { %v1706_v21 = vpack.c.bf16 %v1636_v7, %v1634_v11  ;;  %v1640_v23 = vmul.f32 %v1477_v15, %v1346_v10  ;;  %v1705_v32 = vpack.c.bf16 %v1635_v19, %v1633_v20  ;;  %v1639_v33 = vmul.f32 %v1477_v15, %v1345_v22  ;;  %v1355_v7 = vld [vmem:[%s4744_s1 + $0x140] sm:$0xff]  ;;  %v4150_v11 = vld [vmem:[%s4745_s2 + $0x108] sm:$0xff]  }
  0xb9   :  { %v1472_v25 = vpop.permute.xlu0 %1471  ;;  %v1359_v22 = vld [vmem:[%s4744_s1 + $0x160] sm:$0xff] }
  0xba   :  { %v1638_v26 = vmul.f32 %v1472_v25, %v1344_v17  ;;  %2209 = vmatpush1.bf16.msra.mxu1 %v1703_v18  ;;  %v1637_v35 = vmul.f32 %v1472_v25, %v1343_v24  ;;  %v1360_v17 = vld [vmem:[%s4744_s1 + $0x168] sm:$0xff] }
  0xbb   :  { %2210 = vmatprep.subr.bf16.mxu1 %v1706_v21  ;;  %v1487_v29 = vpop.permute.xlu1 %1486  ;;  %v1361_v21 = vld [vmem:[%s4744_s1 + $0x170] sm:$0xff] }
  0xbc   :  { %v1708_v36 = vpack.c.bf16 %v1640_v23, %v1638_v26  ;;  %v1644_v39 = vmul.f32 %v1487_v29, %v1350_v27  ;;  %v1707_v52 = vpack.c.bf16 %v1639_v33, %v1637_v35  ;;  %v1643_v53 = vmul.f32 %v1487_v29, %v1349_v38  ;;  %v1381_v26 = vld [vmem:[%s4744_s1 + $0x210] sm:$0xff]  ;;  %v1382_v27 = vld [vmem:[%s4744_s1 + $0x218] sm:$0xff]  ;;  %v1379_v35 = vld [vmem:[%s4744_s1 + $0x200] sm:$0xff] }
  0xbd   :  { %v1482_v42 = vpop.permute.xlu0 %1481 }
  0xbe   :  { %v1642_v44 = vmul.f32 %v1482_v42, %v1348_v30  ;;  %2211 = vmatpush1.bf16.msra.mxu1 %v1705_v32  ;;  %v1641_v54 = vmul.f32 %v1482_v42, %v1347_v41 }
  0xbf   :  { %2212 = vmatprep.subr.bf16.mxu1 %v1708_v36  ;;  %v1497_v49 = vpop.permute.xlu1 %1496  ;;  %v1380_v36 = vld [vmem:[%s4744_s1 + $0x208] sm:$0xff] }
  0xc0   :  { %v1710_v55 = vpack.c.bf16 %v1644_v39, %v1642_v44  ;;  %v1648_v57 = vmul.f32 %v1497_v49, %v1354_v43  ;;  %v1709_v0 = vpack.c.bf16 %v1643_v53, %v1641_v54  ;;  %v1647_v1 = vmul.f32 %v1497_v49, %v1353_v56  ;;  %v1365_v44 = vld [vmem:[%s4744_s1 + $0x190] sm:$0xff]  ;;  %v3538_v53 = vld [vmem:[%s4745_s2 + $0x140] sm:$0xff]   ;;  %v3539_v54 = vld [vmem:[%s4745_s2 + $0x148] sm:$0xff]  }
  0xc1   :  { %v1492_v59 = vpop.permute.xlu0 %1491  ;;  %3223 = vst [vmem:[#allocation2 + $0x140] sm:$0xff] %v3538_v53   ;;  %3228 = vst [vmem:[#allocation2 + $0x148] sm:$0xff] %v3539_v54   ;;  %v1371_v53 = vld [vmem:[%s4744_s1 + $0x1c0] sm:$0xff] }
  0xc2   :  { %v1646_v60 = vmul.f32 %v1492_v59, %v1352_v51  ;;  %2213 = vmatpush1.bf16.msra.mxu1 %v1707_v52  ;;  %v1645_v2 = vmul.f32 %v1492_v59, %v1351_v58  ;;  %v4191_v52 = vld [vmem:[%s4745_s2 + $0x120] sm:$0xff]  }
  0xc3   :  { %2214 = vmatprep.subr.bf16.mxu1 %v1710_v55  ;;  %v1507_v62 = vpop.permute.xlu1 %1506 }
  0xc4   :  { %v1712_v4 = vpack.c.bf16 %v1648_v57, %v1646_v60  ;;  %v1652_v6 = vmul.f32 %v1507_v62, %v1358_v61  ;;  %v1711_v18 = vpack.c.bf16 %v1647_v1, %v1645_v2  ;;  %v1651_v19 = vmul.f32 %v1507_v62, %v1357_v5  ;;  %v1364_v57 = vld [vmem:[%s4744_s1 + $0x188] sm:$0xff]  ;;  %v1383_v5 = vld [vmem:[%s4744_s1 + $0x220] sm:$0xff] }
  0xc5   :  { %v1502_v8 = vpop.permute.xlu0 %1501 }
  0xc6   :  { %v1650_v10 = vmul.f32 %v1502_v8, %v1356_v63  ;;  %2215 = vmatpush1.bf16.msra.mxu1 %v1709_v0  ;;  %v1649_v20 = vmul.f32 %v1502_v8, %v1355_v7  ;;  %v1385_v63 = vld [vmem:[%s4744_s1 + $0x230] sm:$0xff]  ;;  %v1386_v0 = vld [vmem:[%s4744_s1 + $0x238] sm:$0xff] }
  0xc7   :  { %2216 = vmatprep.subr.bf16.mxu1 %v1712_v4  ;;  %v1517_v15 = vpop.permute.xlu1 %1516 }
  0xc8   :  { %v1714_v23 = vpack.c.bf16 %v1652_v6, %v1650_v10  ;;  %v1656_v24 = vmul.f32 %v1517_v15, %v1362_v9  ;;  %v1655_v30 = vmul.f32 %v1517_v15, %v1361_v21  ;;  %v1713_v38 = vpack.c.bf16 %v1651_v19, %v1649_v20  ;;  %v1384_v6 = vld [vmem:[%s4744_s1 + $0x228] sm:$0xff]  ;;  %v1370_v15 = vld [vmem:[%s4744_s1 + $0x1b8] sm:$0xff] }
  0xc9   :  { %v1512_v25 = vpop.permute.xlu0 %1511  ;;  %v4226_v20 = vld [vmem:[%s4745_s2 + $0x138] sm:$0xff]  }
  0xca   :  { %v1654_v29 = vmul.f32 %v1512_v25, %v1360_v17  ;;  %2217 = vmatpush1.bf16.msra.mxu1 %v1711_v18  ;;  %v1653_v32 = vmul.f32 %v1512_v25, %v1359_v22  ;;  %v1367_v17 = vld [vmem:[%s4744_s1 + $0x1a0] sm:$0xff]  ;;  %v3542_v21 = vld [vmem:[%s4745_s2 + $0x158] sm:$0xff]  }
  0xcb   :  { %2218 = vmatprep.subr.bf16.mxu1 %v1714_v23  ;;  %v1567_v33 = vpop.permute.xlu1 %1566  ;;  %v3543_v22 = vld [vmem:[%s4745_s2 + $0x160] sm:$0xff]   ;;  %3238 = vst [vmem:[#allocation2 + $0x158] sm:$0xff] %v3542_v21  }
  0xcc   :  { %v1675_v39 = vmul.f32 %v1567_v33, %v1381_v26  ;;  %v1676_v41 = vmul.f32 %v1567_v33, %v1382_v27  ;;  %v1716_v42 = vpack.c.bf16 %v1656_v24, %v1654_v29  ;;  %v1715_v55 = vpack.c.bf16 %v1655_v30, %v1653_v32  ;;  %v1368_v24 = vld [vmem:[%s4744_s1 + $0x1a8] sm:$0xff]  ;;  %3243 = vst [vmem:[#allocation2 + $0x160] sm:$0xff] %v3543_v22   ;;  %v1389_v32 = vld [vmem:[%s4744_s1 + $0x250] sm:$0xff]  ;;  %v1390_v33 = vld [vmem:[%s4744_s1 + $0x258] sm:$0xff] }
  0xcd   :  { %v1562_v43 = vpop.permute.xlu0 %1561  ;;  %v1375_v21 = vld [vmem:[%s4744_s1 + $0x1e0] sm:$0xff] }
  0xce   :  { %v1673_v49 = vmul.f32 %v1562_v43, %v1379_v35  ;;  %v1674_v51 = vmul.f32 %v1562_v43, %v1380_v36  ;;  %2219 = vmatpush1.bf16.msra.mxu1 %v1713_v38 }
  0xcf   :  { %2220 = vmatprep.subr.bf16.mxu1 %v1716_v42  ;;  %v1527_v56 = vpop.permute.xlu1 %1526 }
  0xd0   :  { %v1659_v58 = vmul.f32 %v1527_v56, %v1365_v44  ;;  %v1660_v59 = vmul.f32 %v1527_v56, %v1366_v46  ;;  %v1726_v60 = vpack.c.bf16 %v1676_v41, %v1674_v51  ;;  %v1725_v61 = vpack.c.bf16 %v1675_v39, %v1673_v49  ;;  %v1387_v39 = vld [vmem:[%s4744_s1 + $0x240] sm:$0xff]  ;;  %v1388_v41 = vld [vmem:[%s4744_s1 + $0x248] sm:$0xff]  ;;  %v1373_v49 = vld [vmem:[%s4744_s1 + $0x1d0] sm:$0xff] }
  0xd1   :  { %v1522_v62 = vpop.permute.xlu0 %1521  ;;  %v1374_v51 = vld [vmem:[%s4744_s1 + $0x1d8] sm:$0xff]  ;;  %v4261_v56 = vld [vmem:[%s4745_s2 + $0x150] sm:$0xff]  }
  0xd2   :  { %v1657_v1 = vmul.f32 %v1522_v62, %v1363_v47  ;;  %v1658_v2 = vmul.f32 %v1522_v62, %v1364_v57  ;;  %2441 = vmatprep.subr.bf16.mxu0 %v1726_v60  ;;  %2221 = vmatpush1.bf16.msra.mxu1 %v1715_v55  ;;  %v3546_v57 = vld [vmem:[%s4745_s2 + $0x170] sm:$0xff]   ;;  %v1372_v60 = vld [vmem:[%s4744_s1 + $0x1c8] sm:$0xff] }
  0xd3   :  { %2442 = vmatpush1.bf16.msra.mxu0 %v1725_v61  ;;  %v1577_v4 = vpop.permute.xlu1 %1576  ;;  %3253 = vst [vmem:[#allocation2 + $0x170] sm:$0xff] %v3546_v57   ;;  %v3485_v57 = vld [vmem:[#allocation2] ss:$12 sps:$4 sm:$0xff]  }
  0xd4   :  { %v1717_v7 = vpack.c.bf16 %v1659_v58, %v1657_v1  ;;  %v1718_v8 = vpack.c.bf16 %v1660_v59, %v1658_v2  ;;  %v1679_v9 = vmul.f32 %v1577_v4, %v1385_v63  ;;  %v1680_v10 = vmul.f32 %v1577_v4, %v1386_v0  ;;  %v3547_v58 = vld [vmem:[%s4745_s2 + $0x178] sm:$0xff]   ;;  %v1393_v2 = vld [vmem:[%s4744_s1 + $0x270] sm:$0xff] }
  0xd5   :  { %v1572_v13 = vpop.permute.xlu0 %1571  ;;  %3258 = vst [vmem:[#allocation2 + $0x178] sm:$0xff] %v3547_v58   ;;  %v1394_v4 = vld [vmem:[%s4744_s1 + $0x278] sm:$0xff] }
  0xd6   :  { %v1677_v18 = vmul.f32 %v1572_v13, %v1383_v5  ;;  %v1678_v19 = vmul.f32 %v1572_v13, %v1384_v6  ;;  %2222 = vmatprep.subr.bf16.mxu1 %v1718_v8  ;;  %v1391_v8 = vld [vmem:[%s4744_s1 + $0x260] sm:$0xff] }
  0xd7   :  { %2223 = vmatpush1.bf16.msra.mxu1 %v1717_v7  ;;  %v1537_v23 = vpop.permute.xlu1 %1536 }
  0xd8   :  { %v1727_v25 = vpack.c.bf16 %v1679_v9, %v1677_v18  ;;  %v1728_v26 = vpack.c.bf16 %v1680_v10, %v1678_v19  ;;  %v1663_v27 = vmul.f32 %v1537_v23, %v1369_v14  ;;  %v1664_v29 = vmul.f32 %v1537_v23, %v1370_v15  ;;  %v1392_v9 = vld [vmem:[%s4744_s1 + $0x268] sm:$0xff]  ;;  %v1377_v18 = vld [vmem:[%s4744_s1 + $0x1f0] sm:$0xff]  ;;  %v1378_v19 = vld [vmem:[%s4744_s1 + $0x1f8] sm:$0xff] }
  0xd9   :  { %v1532_v30 = vpop.permute.xlu0 %1531 }
  0xda   :  { %v1661_v35 = vmul.f32 %v1532_v30, %v1367_v17  ;;  %v1662_v36 = vmul.f32 %v1532_v30, %v1368_v24  ;;  %2443 = vmatprep.subr.bf16.mxu0 %v1728_v26  ;;  %v4296_v24 = vld [vmem:[%s4745_s2 + $0x168] sm:$0xff]   ;;  %v3551_v26 = vld [vmem:[%s4745_s2 + $0x190] sm:$0xff]  }
  0xdb   :  { %2444 = vmatpush1.bf16.msra.mxu0 %v1727_v25  ;;  %v1587_v38 = vpop.permute.xlu1 %1586  ;;  %v3550_v25 = vld [vmem:[%s4745_s2 + $0x188] sm:$0xff]   ;;  %3273 = vst [vmem:[#allocation2 + $0x190] sm:$0xff] %v3551_v26  }
  0xdc   :  { %v1719_v42 = vpack.c.bf16 %v1663_v27, %v1661_v35  ;;  %v1720_v43 = vpack.c.bf16 %v1664_v29, %v1662_v36  ;;  %v1683_v44 = vmul.f32 %v1587_v38, %v1389_v32  ;;  %v1684_v46 = vmul.f32 %v1587_v38, %v1390_v33  ;;  %v1376_v29 = vld [vmem:[%s4744_s1 + $0x1e8] sm:$0xff]  ;;  %3268 = vst [vmem:[#allocation2 + $0x188] sm:$0xff] %v3550_v25   ;;  %v1397_v38 = vld [vmem:[%s4744_s1 + $0x290] sm:$0xff] }
  0xdd   :  { %v1582_v47 = vpop.permute.xlu0 %1581  ;;  %v3567_v25 = vld [vmem:[%s4745_s2 + $0x1f0] sm:$0xff]  }
  0xde   :  { %v1681_v54 = vmul.f32 %v1582_v47, %v1387_v39  ;;  %v1682_v55 = vmul.f32 %v1582_v47, %v1388_v41  ;;  %2224 = vmatprep.subr.bf16.mxu1 %v1720_v43  ;;  %v1398_v39 = vld [vmem:[%s4744_s1 + $0x298] sm:$0xff]  ;;  %3333 = vst [vmem:[#allocation2 + $0x1f0] sm:$0xff] %v3567_v25  }
  0xdf   :  { %2225 = vmatpush1.bf16.msra.mxu1 %v1719_v42  ;;  %v1547_v59 = vpop.permute.xlu1 %1546 }
  0xe0   :  { %v1729_v61 = vpack.c.bf16 %v1683_v44, %v1681_v54  ;;  %v1730_v62 = vpack.c.bf16 %v1684_v46, %v1682_v55  ;;  %v1667_v63 = vmul.f32 %v1547_v59, %v1373_v49  ;;  %v1668_v0 = vmul.f32 %v1547_v59, %v1374_v51  ;;  %v1395_v44 = vld [vmem:[%s4744_s1 + $0x280] sm:$0xff]  ;;  %v1396_v46 = vld [vmem:[%s4744_s1 + $0x288] sm:$0xff] }
  0xe1   :  { %v1542_v1 = vpop.permute.xlu0 %1541  ;;  %v1741_v54 = vld [vmem:[#allocation2 + $0x24] sm:$0xff] }
  0xe2   :  { %v1665_v5 = vmul.f32 %v1542_v1, %v1371_v53  ;;  %v1666_v6 = vmul.f32 %v1542_v1, %v1372_v60  ;;  %2445 = vmatprep.subr.bf16.mxu0 %v1730_v62  ;;  %v4322_v60 = vld [vmem:[%s4745_s2 + $0x180] sm:$0xff]   ;;  %v3555_v62 = vld [vmem:[%s4745_s2 + $0x1a8] sm:$0xff]  }
  0xe3   :  { %2446 = vmatpush1.bf16.msra.mxu0 %v1729_v61  ;;  %v1597_v7 = vpop.permute.xlu1 %1596  ;;  %v3554_v61 = vld [vmem:[%s4745_s2 + $0x1a0] sm:$0xff]   ;;  %3288 = vst [vmem:[#allocation2 + $0x1a8] sm:$0xff] %v3555_v62  }
  0xe4   :  { %v1721_v10 = vpack.c.bf16 %v1667_v63, %v1665_v5  ;;  %v1722_v13 = vpack.c.bf16 %v1668_v0, %v1666_v6  ;;  %v1687_v14 = vmul.f32 %v1597_v7, %v1393_v2  ;;  %v1688_v15 = vmul.f32 %v1597_v7, %v1394_v4  ;;  %3283 = vst [vmem:[#allocation2 + $0x1a0] sm:$0xff] %v3554_v61   ;;  %v3488_v2 = vld [vmem:[#allocation2 + $0x8] ss:$12 sps:$4 sm:$0xff]   ;;  %v1745_v4 = vld [vmem:[#allocation2 + $0x3c] sm:$0xff]  ;;  %v3528_v61 = vld [vmem:[#allocation2 + $0xf8] ss:$12 sps:$4 sm:$0xff]  }
  0xe5   :  { %v1592_v17 = vpop.permute.xlu0 %1591  ;;  %v2944_v63 = vcombine.high %v3905_v28, %v1741_v54  ;;  %v2943_v5 = vcombine.low %v3905_v28, %v1741_v54  ;;  %v4336_v6 = vld [vmem:[%s4745_s2 + $0x198] sm:$0xff]   ;;  %v3492_v28 = vld [vmem:[#allocation2 + $0x20] ss:$12 sps:$4 sm:$0xff]  }
  0xe6   :  { %v1685_v22 = vmul.f32 %v1592_v17, %v1391_v8  ;;  %v1686_v23 = vmul.f32 %v1592_v17, %v1392_v9  ;;  %2226 = vmatprep.subr.bf16.mxu1 %v1722_v13  ;;  %v3558_v7 = vld [vmem:[%s4745_s2 + $0x1b8] sm:$0xff]   ;;  %v3559_v8 = vld [vmem:[%s4745_s2 + $0x1c0] sm:$0xff]   ;;  %v2947_v9 = vcombine.high %v3916_v31, %v1745_v4  ;;  %v2946_v13 = vcombine.low %v3916_v31, %v1745_v4  ;;  %v3536_v4 = vld [vmem:[#allocation2 + $0x128] ss:$12 sps:$4 sm:$0xff]  }
  0xe7   :  { %2227 = vmatpush1.bf16.msra.mxu1 %v1721_v10  ;;  %v1557_v27 = vpop.permute.xlu1 %1556  ;;  %3298 = vst [vmem:[#allocation2 + $0x1b8] sm:$0xff] %v3558_v7   ;;  %3303 = vst [vmem:[#allocation2 + $0x1c0] sm:$0xff] %v3559_v8   ;;  %v1749_v10 = vld [vmem:[#allocation2 + $0x54] sm:$0xff]  ;;  %v3540_v8 = vld [vmem:[#allocation2 + $0x140] ss:$12 sps:$4 sm:$0xff]  }
  0xe8   :  { %v1731_v30 = vpack.c.bf16 %v1687_v14, %v1685_v22  ;;  %v1732_v32 = vpack.c.bf16 %v1688_v15, %v1686_v23  ;;  %v1671_v33 = vmul.f32 %v1557_v27, %v1377_v18  ;;  %v1672_v35 = vmul.f32 %v1557_v27, %v1378_v19  ;;  %v4351_v14 = vld [vmem:[%s4745_s2 + $0x1b0] sm:$0xff]   ;;  %v3563_v17 = vld [vmem:[%s4745_s2 + $0x1d8] sm:$0xff]   ;;  %v4366_v22 = vld [vmem:[%s4745_s2 + $0x1c8] sm:$0xff]  }
  0xe9   :  { %v1552_v36 = vpop.permute.xlu0 %1551  ;;  %v3562_v15 = vld [vmem:[%s4745_s2 + $0x1d0] sm:$0xff]   ;;  %v2950_v18 = vcombine.high %v3927_v34, %v1749_v10  ;;  %3318 = vst [vmem:[#allocation2 + $0x1d8] sm:$0xff] %v3563_v17   ;;  %v3496_v31 = vld [vmem:[#allocation2 + $0x38] ss:$12 sps:$4 sm:$0xff]   ;;  %v3566_v23 = vld [vmem:[%s4745_s2 + $0x1e8] sm:$0xff]  }
  0xea   :  { %v1669_v41 = vmul.f32 %v1552_v36, %v1375_v21  ;;  %v1670_v42 = vmul.f32 %v1552_v36, %v1376_v29  ;;  %2447 = vmatprep.subr.bf16.mxu0 %v1732_v32  ;;  %3313 = vst [vmem:[#allocation2 + $0x1d0] sm:$0xff] %v3562_v15   ;;  %v1753_v19 = vld [vmem:[#allocation2 + $0x6c] sm:$0xff]  ;;  %v2949_v21 = vcombine.low %v3927_v34, %v1749_v10  ;;  %3328 = vst [vmem:[#allocation2 + $0x1e8] sm:$0xff] %v3566_v23   ;;  %v1757_v27 = vld [vmem:[#allocation2 + $0x84] sm:$0xff] }
  0xeb   :  { %2448 = vmatpush1.bf16.msra.mxu0 %v1731_v30  ;;  %v1607_v43 = vpop.permute.xlu1 %1606  ;;  %v2953_v26 = vcombine.high %v3938_v37, %v1753_v19  ;;  %v3500_v34 = vld [vmem:[#allocation2 + $0x50] ss:$12 sps:$4 sm:$0xff]   ;;  %v2952_v29 = vcombine.low %v3938_v37, %v1753_v19  ;;  %v4381_v30 = vld [vmem:[%s4745_s2 + $0x1e0] sm:$0xff]   ;;  %v2956_v32 = vcombine.high %v3949_v40, %v1757_v27  ;;  %v2955_v36 = vcombine.low %v3949_v40, %v1757_v27  ;;  %v3552_v19 = vld [vmem:[#allocation2 + $0x188] ss:$12 sps:$4 sm:$0xff]  }
  0xec   :  { %v1723_v47 = vpack.c.bf16 %v1671_v33, %v1669_v41  ;;  %v1724_v49 = vpack.c.bf16 %v1672_v35, %v1670_v42  ;;  %v1691_v51 = vmul.f32 %v1607_v43, %v1397_v38  ;;  %v1692_v53 = vmul.f32 %v1607_v43, %v1398_v39  ;;  %v3504_v33 = vld [vmem:[#allocation2 + $0x68] ss:$12 sps:$4 sm:$0xff]   ;;  %v1761_v35 = vld [vmem:[#allocation2 + $0x9c] sm:$0xff]  ;;  %v3512_v43 = vld [vmem:[#allocation2 + $0x98] ss:$12 sps:$4 sm:$0xff]  }
  0xed   :  { %v1602_v55 = vpop.permute.xlu0 %1601  ;;  %v2959_v37 = vcombine.high %v3975_v50, %v1761_v35  ;;  %v3508_v38 = vld [vmem:[#allocation2 + $0x80] ss:$12 sps:$4 sm:$0xff]   ;;  %v1765_v39 = vld [vmem:[#allocation2 + $0xb4] sm:$0xff]  ;;  %v2958_v41 = vcombine.low %v3975_v50, %v1761_v35  ;;  %v1773_v50 = vld [vmem:[#allocation2 + $0xe4] sm:$0xff] }
  0xee   :  { %v1689_v58 = vmul.f32 %v1602_v55, %v1395_v44  ;;  %v1690_v59 = vmul.f32 %v1602_v55, %v1396_v46  ;;  %2228 = vmatprep.subr.bf16.mxu1 %v1724_v49  ;;  %v2962_v42 = vcombine.high %v4013_v16, %v1765_v39  ;;  %v1769_v40 = vld [vmem:[#allocation2 + $0xcc] sm:$0xff]  ;;  %v2961_v44 = vcombine.low %v4013_v16, %v1765_v39  ;;  %v1777_v16 = vld [vmem:[#allocation2 + $0xfc] sm:$0xff]  ;;  %v3544_v10 = vld [vmem:[#allocation2 + $0x158] ss:$12 sps:$4 sm:$0xff]  }
  0xef   :  { %2229 = vmatpush1.bf16.msra.mxu1 %v1723_v47  ;;  %v2965_v46 = vcombine.high %v4048_v48, %v1769_v40  ;;  %v3516_v47 = vld [vmem:[#allocation2 + $0xb0] ss:$12 sps:$4 sm:$0xff]   ;;  %v2964_v49 = vcombine.low %v4048_v48, %v1769_v40  ;;  %v2967_v54 = vcombine.low %v4080_v12, %v1773_v50  ;;  %v2971_v55 = vcombine.high %v4115_v45, %v1777_v16  ;;  %v1781_v48 = vld [vmem:[#allocation2 + $0x114] sm:$0xff]  ;;  %v3556_v25 = vld [vmem:[#allocation2 + $0x1a0] ss:$12 sps:$4 sm:$0xff]  }
  0xf0   :  { %v1733_v0 = vpack.c.bf16 %v1691_v51, %v1689_v58  ;;  %v1734_v1 = vpack.c.bf16 %v1692_v53, %v1690_v59  ;;  %v2968_v51 = vcombine.high %v4080_v12, %v1773_v50  ;;  %v3520_v53 = vld [vmem:[#allocation2 + $0xc8] ss:$12 sps:$4 sm:$0xff]   ;;  %v2970_v58 = vcombine.low %v4115_v45, %v1777_v16  ;;  %v1785_v12 = vld [vmem:[#allocation2 + $0x12c] sm:$0xff]  ;;  %v3560_v27 = vld [vmem:[#allocation2 + $0x1b8] ss:$12 sps:$4 sm:$0xff]  }
  0xf1   :  { %v2974_v59 = vcombine.high %v4150_v11, %v1781_v48  ;;  %v2973_v62 = vcombine.low %v4150_v11, %v1781_v48  ;;  %v1789_v45 = vld [vmem:[#allocation2 + $0x144] sm:$0xff]  ;;  %v1793_v11 = vld [vmem:[#allocation2 + $0x15c] sm:$0xff] }
  0xf2   :  { %2449 = vmatprep.subr.bf16.mxu0 %v1734_v1  ;;  %2231 = vmatmul.mubr.bf16.vlgmr.msra.gmra.mrb[0].mxu1 %v3485_v57  ;;  %v3524_v57 = vld [vmem:[#allocation2 + $0xe0] ss:$12 sps:$4 sm:$0xff]   ;;  %v2976_v1 = vcombine.low %v4191_v52, %v1785_v12  ;;  %v2983_v7 = vcombine.high %v4261_v56, %v1793_v11  ;;  %v3548_v17 = vld [vmem:[#allocation2 + $0x170] ss:$12 sps:$4 sm:$0xff]   ;;  %v3568_v35 = vld [vmem:[#allocation2 + $0x1e8] ss:$12 sps:$4 sm:$0xff]  }
  0xf3   :  { %2450 = vmatpush1.bf16.msra.mxu0 %v1733_v0  ;;  %2240 = vmatprep.mubr.bf16.mxu1 %v2944_v63  ;;  %v2977_v63 = vcombine.high %v4191_v52, %v1785_v12  ;;  %v3532_v0 = vld [vmem:[#allocation2 + $0x110] ss:$12 sps:$4 sm:$0xff]   ;;  %v1797_v52 = vld [vmem:[#allocation2 + $0x174] sm:$0xff] }
  0xf6   :  { %3003 = vmatmul.mubr.msk.bf16.vlgmr.msra.gmra.mrb[0].mxu0 %vm2134_vm0, %v3488_v2  ;;  %v2980_v2 = vcombine.high %v4226_v20, %v1789_v45 }
  0xf7   :  { %2483 = vmatprep.mubr.bf16.mxu0 %v3737_v3 }
  0xfa   :  { %2241 = vmatmul.mubr.bf16.gmra.mrb[4].mxu1 %v2943_v5  ;;  %v2979_v5 = vcombine.low %v4226_v20, %v1789_v45  ;;  %v1801_v20 = vld [vmem:[#allocation2 + $0x18c] sm:$0xff] }
  0xfb   :  { %2250 = vmatprep.mubr.bf16.mxu1 %v2947_v9  ;;  %v2982_v9 = vcombine.low %v4261_v56, %v1793_v11  ;;  %v2989_v15 = vcombine.high %v4322_v60, %v1801_v20  ;;  %v1805_v56 = vld [vmem:[#allocation2 + $0x1a4] sm:$0xff] }
  0xfe   :  { %3004 = vmatmul.mubr.msk.bf16.gmra.mrb[4].mxu0 %vm2134_vm0, %v3492_v28  ;;  %v2986_v28 = vcombine.high %v4296_v24, %v1797_v52 }
  0xff   :  { %2493 = vmatprep.mubr.bf16.mxu0 %v3737_v3 }
 0x102   :  { %2251 = vmatmul.mubr.bf16.gmra.mrb[8].mxu1 %v2946_v13  ;;  %v2985_v13 = vcombine.low %v4296_v24, %v1797_v52  ;;  %v1809_v24 = vld [vmem:[#allocation2 + $0x1bc] sm:$0xff] }
 0x103   :  { %2260 = vmatprep.mubr.bf16.mxu1 %v2950_v18  ;;  %v2988_v18 = vcombine.low %v4322_v60, %v1801_v20  ;;  %v2995_v23 = vcombine.high %v4351_v14, %v1809_v24  ;;  %v1813_v60 = vld [vmem:[#allocation2 + $0x1d4] sm:$0xff] }
 0x106   :  { %3005 = vmatmul.mubr.msk.bf16.gmra.mrb[8].mxu0 %vm2134_vm0, %v3496_v31  ;;  %v2992_v31 = vcombine.high %v4336_v6, %v1805_v56 }
 0x107   :  { %2503 = vmatprep.mubr.bf16.mxu0 %v3737_v3 }
 0x10a   :  { %2261 = vmatmul.mubr.bf16.gmra.mrb[12].mxu1 %v2949_v21  ;;  %v2991_v21 = vcombine.low %v4336_v6, %v1805_v56  ;;  %v1817_v6 = vld [vmem:[#allocation2 + $0x1ec] sm:$0xff] }
 0x10b   :  { %2270 = vmatprep.mubr.bf16.mxu1 %v2953_v26  ;;  %v2994_v26 = vcombine.low %v4351_v14, %v1809_v24  ;;  %v3000_v14 = vcombine.low %v4381_v30, %v1817_v6 }
 0x10e   :  { %3006 = vmatmul.mubr.msk.bf16.gmra.mrb[12].mxu0 %vm2134_vm0, %v3500_v34  ;;  %v2998_v34 = vcombine.high %v4366_v22, %v1813_v60 }
 0x10f   :  { %2513 = vmatprep.mubr.bf16.mxu0 %v3737_v3 }
 0x112   :  { %2271 = vmatmul.mubr.bf16.gmra.mrb[16].mxu1 %v2952_v29  ;;  %v2997_v29 = vcombine.low %v4366_v22, %v1813_v60 }
 0x113   :  { %2280 = vmatprep.mubr.bf16.mxu1 %v2956_v32  ;;  %v3001_v32 = vcombine.high %v4381_v30, %v1817_v6 }
 0x116   :  { %3007 = vmatmul.mubr.msk.bf16.gmra.mrb[16].mxu0 %vm2134_vm0, %v3504_v33  ;;  %v3564_v33 = vld [vmem:[#allocation2 + $0x1d0] ss:$12 sps:$4 sm:$0xff]  }
 0x117   :  { %2523 = vmatprep.mubr.bf16.mxu0 %v3737_v3 }
 0x11a   :  { %2281 = vmatmul.mubr.bf16.gmra.mrb[20].mxu1 %v2955_v36 }
 0x11b   :  { %2290 = vmatprep.mubr.bf16.mxu1 %v2959_v37 }
 0x11e   :  { %3008 = vmatmul.mubr.msk.bf16.gmra.mrb[20].mxu0 %vm2134_vm0, %v3508_v38 }
 0x11f   :  { %2533 = vmatprep.mubr.bf16.mxu0 %v3737_v3 }
 0x122   :  { %2291 = vmatmul.mubr.bf16.gmra.mrb[24].mxu1 %v2958_v41 }
 0x123   :  { %2300 = vmatprep.mubr.bf16.mxu1 %v2962_v42 }
 0x126   :  { %3009 = vmatmul.mubr.msk.bf16.gmra.mrb[24].mxu0 %vm2134_vm0, %v3512_v43 }
 0x127   :  { %2543 = vmatprep.mubr.bf16.mxu0 %v3737_v3 }
 0x12a   :  { %2301 = vmatmul.mubr.bf16.gmra.mrb[28].mxu1 %v2961_v44 }
 0x12b   :  { %2310 = vmatprep.mubr.bf16.mxu1 %v2965_v46 }
 0x12e   :  { %3010 = vmatmul.mubr.msk.bf16.gmra.mrb[28].mxu0 %vm2134_vm0, %v3516_v47 }
 0x12f   :  { %2553 = vmatprep.mubr.bf16.mxu0 %v3737_v3 }
 0x132   :  { %2311 = vmatmul.mubr.bf16.gmra.mrb[32].mxu1 %v2964_v49 }
 0x133   :  { %2320 = vmatprep.mubr.bf16.mxu1 %v2968_v51 }
 0x136   :  { %3011 = vmatmul.mubr.msk.bf16.gmra.mrb[32].mxu0 %vm2134_vm0, %v3520_v53 }
 0x137   :  { %2563 = vmatprep.mubr.bf16.mxu0 %v3737_v3 }
 0x13a   :  { %2321 = vmatmul.mubr.bf16.gmra.mrb[36].mxu1 %v2967_v54 }
 0x13b   :  { %2330 = vmatprep.mubr.bf16.mxu1 %v2971_v55 }
 0x13e   :  { %3012 = vmatmul.mubr.msk.bf16.gmra.mrb[36].mxu0 %vm2134_vm0, %v3524_v57 }
 0x13f   :  { %2573 = vmatprep.mubr.bf16.mxu0 %v3737_v3 }
 0x142   :  { %2331 = vmatmul.mubr.bf16.gmra.mrb[40].mxu1 %v2970_v58 }
 0x143   :  { %2340 = vmatprep.mubr.bf16.mxu1 %v2974_v59 }
 0x146   :  { %3013 = vmatmul.mubr.msk.bf16.gmra.mrb[40].mxu0 %vm2134_vm0, %v3528_v61 }
 0x147   :  { %2583 = vmatprep.mubr.bf16.mxu0 %v3737_v3 }
 0x14a   :  { %2341 = vmatmul.mubr.bf16.gmra.mrb[44].mxu1 %v2973_v62 }
 0x14b   :  { %2350 = vmatprep.mubr.bf16.mxu1 %v2977_v63 }
 0x14e   :  { %3014 = vmatmul.mubr.msk.bf16.gmra.mrb[44].mxu0 %vm2134_vm0, %v3532_v0 }
 0x14f   :  { %2593 = vmatprep.mubr.bf16.mxu0 %v3737_v3 }
 0x152   :  { %2351 = vmatmul.mubr.bf16.gmra.mrb[48].mxu1 %v2976_v1 }
 0x153   :  { %2360 = vmatprep.mubr.bf16.mxu1 %v2980_v2 }
 0x156   :  { %3015 = vmatmul.mubr.msk.bf16.gmra.mrb[48].mxu0 %vm2134_vm0, %v3536_v4 }
 0x157   :  { %2603 = vmatprep.mubr.bf16.mxu0 %v3737_v3 }
 0x15a   :  { %2361 = vmatmul.mubr.bf16.gmra.mrb[52].mxu1 %v2979_v5 }
 0x15b   :  { %2370 = vmatprep.mubr.bf16.mxu1 %v2983_v7 }
 0x15e   :  { %3016 = vmatmul.mubr.msk.bf16.gmra.mrb[52].mxu0 %vm2134_vm0, %v3540_v8 }
 0x15f   :  { %2613 = vmatprep.mubr.bf16.mxu0 %v3737_v3 }
 0x162   :  { %2371 = vmatmul.mubr.bf16.gmra.mrb[56].mxu1 %v2982_v9 }
 0x163   :  { %2380 = vmatprep.mubr.bf16.mxu1 %v2986_v28 }
 0x166   :  { %3017 = vmatmul.mubr.msk.bf16.gmra.mrb[56].mxu0 %vm2134_vm0, %v3544_v10 }
 0x167   :  { %2623 = vmatprep.mubr.bf16.mxu0 %v3737_v3 }
 0x16a   :  { %2381 = vmatmul.mubr.bf16.gmra.mrb[60].mxu1 %v2985_v13 }
 0x16b   :  { %2390 = vmatprep.mubr.bf16.mxu1 %v2989_v15 }
 0x16e   :  { %3018 = vmatmul.mubr.msk.bf16.gmra.mrb[60].mxu0 %vm2134_vm0, %v3548_v17 }
 0x16f   :  { %2633 = vmatprep.mubr.bf16.mxu0 %v3737_v3 }
 0x172   :  { %2391 = vmatmul.mubr.bf16.gmra.mrb[64].mxu1 %v2988_v18 }
 0x173   :  { %2400 = vmatprep.mubr.bf16.mxu1 %v2992_v31 }
 0x176   :  { %3019 = vmatmul.mubr.msk.bf16.gmra.mrb[64].mxu0 %vm2134_vm0, %v3552_v19 }
 0x177   :  { %2643 = vmatprep.mubr.bf16.mxu0 %v3737_v3 }
 0x17a   :  { %2401 = vmatmul.mubr.bf16.gmra.mrb[68].mxu1 %v2991_v21 }
 0x17b   :  { %2410 = vmatprep.mubr.bf16.mxu1 %v2995_v23 }
 0x17e   :  { %3020 = vmatmul.mubr.msk.bf16.gmra.mrb[68].mxu0 %vm2134_vm0, %v3556_v25 }
 0x17f   :  { %2653 = vmatprep.mubr.bf16.mxu0 %v3737_v3 }
 0x182   :  { %2411 = vmatmul.mubr.bf16.gmra.mrb[72].mxu1 %v2994_v26 }
 0x183   :  { %2420 = vmatprep.mubr.bf16.mxu1 %v2998_v34 }
 0x186   :  { %3021 = vmatmul.mubr.msk.bf16.gmra.mrb[72].mxu0 %vm2134_vm0, %v3560_v27 }
 0x187   :  { %2663 = vmatprep.mubr.bf16.mxu0 %v3737_v3 }
 0x18a   :  { %2421 = vmatmul.mubr.bf16.gmra.mrb[76].mxu1 %v2997_v29 }
 0x18b   :  { %2430 = vmatprep.mubr.bf16.mxu1 %v3001_v32 }
 0x18e   :  { %3022 = vmatmul.mubr.msk.bf16.gmra.mrb[76].mxu0 %vm2134_vm0, %v3564_v33 }
 0x18f   :  { %2673 = vmatprep.mubr.bf16.mxu0 %v3737_v3 }
 0x192   :  { %2431 = vmatmul.mubr.bf16.gmra.mrb[80].mxu1 %v3000_v14 }
 0x196   :  { %3023 = vmatmul.mubr.msk.bf16.gmra.mrb[80].mxu0 %vm2134_vm0, %v3568_v35 }
 0x1c5   :  { %v2232_v36 = vpop.f32.mrb[0].mxu1 }
 0x1c6   :  { %v2234_v37 = vpop.f32.mrb[1].mxu1 }
 0x1c7   :  { %v2236_v22 = vpop.f32.mrb[2].mxu1 }
 0x1c8   :  { %v2238_v38 = vpop.f32.mrb[3].mxu1 }
 0x1c9   :  { %v2475_v39 = vpop.f32.mrb[0].mxu0 }
 0x1ca   :  { %v2476_v41 = vadd.f32 %v2475_v39, %v2232_v36  ;;  %v2477_v42 = vpop.f32.mrb[1].mxu0 }
 0x1cb   :  { %v2478_v43 = vadd.f32 %v2477_v42, %v2234_v37  ;;  %v2479_v40 = vpop.f32.mrb[2].mxu0 }
 0x1cc   :  { %2684 = vst [vmem:[%s4746_s3] sm:$0xff] %v2476_v41  ;;  %v2480_v30 = vadd.f32 %v2479_v40, %v2236_v22  ;;  %v2481_v3 = vpop.f32.mrb[3].mxu0 }
 0x1cd   :  { %2686 = vst.msk [vmem:[%s4746_s3 + $0x8] sm:$0xff] %vm2685_vm1, %v2478_v43  ;;  %v2482_v44 = vadd.f32 %v2481_v3, %v2238_v38  ;;  %v2242_v46 = vpop.f32.mrb[4].mxu1 }
 0x1ce   :  { %2687 = vst [vmem:[%s4746_s3 + $0x10] sm:$0xff] %v2480_v30  ;;  %v2244_v47 = vpop.f32.mrb[5].mxu1 }
 0x1cf   :  { %2688 = vst.msk [vmem:[%s4746_s3 + $0x18] sm:$0xff] %vm2685_vm1, %v2482_v44  ;;  %v2246_v50 = vpop.f32.mrb[6].mxu1 }
 0x1d0   :  { %v2248_v49 = vpop.f32.mrb[7].mxu1 }
 0x1d1   :  { %v2485_v51 = vpop.f32.mrb[4].mxu0 }
 0x1d2   :  { %v2486_v53 = vadd.f32 %v2485_v51, %v2242_v46  ;;  %v2487_v16 = vpop.f32.mrb[5].mxu0 }
 0x1d3   :  { %v2488_v54 = vadd.f32 %v2487_v16, %v2244_v47  ;;  %v2489_v55 = vpop.f32.mrb[6].mxu0 }
 0x1d4   :  { %2689 = vst [vmem:[%s4746_s3 + $0x20] sm:$0xff] %v2486_v53  ;;  %v2490_v57 = vadd.f32 %v2489_v55, %v2246_v50  ;;  %v2491_v48 = vpop.f32.mrb[7].mxu0 }
 0x1d5   :  { %2690 = vst.msk [vmem:[%s4746_s3 + $0x28] sm:$0xff] %vm2685_vm1, %v2488_v54  ;;  %v2492_v58 = vadd.f32 %v2491_v48, %v2248_v49  ;;  %v2252_v59 = vpop.f32.mrb[8].mxu1 }
 0x1d6   :  { %2691 = vst [vmem:[%s4746_s3 + $0x30] sm:$0xff] %v2490_v57  ;;  %v2254_v61 = vpop.f32.mrb[9].mxu1 }
 0x1d7   :  { %2692 = vst.msk [vmem:[%s4746_s3 + $0x38] sm:$0xff] %vm2685_vm1, %v2492_v58  ;;  %v2256_v12 = vpop.f32.mrb[10].mxu1 }
 0x1d8   :  { %v2258_v62 = vpop.f32.mrb[11].mxu1 }
 0x1d9   :  { %v2495_v63 = vpop.f32.mrb[8].mxu0 }
 0x1da   :  { %v2496_v0 = vadd.f32 %v2495_v63, %v2252_v59  ;;  %v2497_v45 = vpop.f32.mrb[9].mxu0 }
 0x1db   :  { %v2498_v1 = vadd.f32 %v2497_v45, %v2254_v61  ;;  %v2499_v2 = vpop.f32.mrb[10].mxu0 }
 0x1dc   :  { %2693 = vst [vmem:[%s4746_s3 + $0x40] sm:$0xff] %v2496_v0  ;;  %v2500_v4 = vadd.f32 %v2499_v2, %v2256_v12  ;;  %v2501_v11 = vpop.f32.mrb[11].mxu0 }
 0x1dd   :  { %2694 = vst.msk [vmem:[%s4746_s3 + $0x48] sm:$0xff] %vm2685_vm1, %v2498_v1  ;;  %v2502_v5 = vadd.f32 %v2501_v11, %v2258_v62  ;;  %v2262_v7 = vpop.f32.mrb[12].mxu1 }
 0x1de   :  { %2695 = vst [vmem:[%s4746_s3 + $0x50] sm:$0xff] %v2500_v4  ;;  %v2264_v8 = vpop.f32.mrb[13].mxu1 }
 0x1df   :  { %2696 = vst.msk [vmem:[%s4746_s3 + $0x58] sm:$0xff] %vm2685_vm1, %v2502_v5  ;;  %v2266_v52 = vpop.f32.mrb[14].mxu1 }
 0x1e0   :  { %v2268_v9 = vpop.f32.mrb[15].mxu1 }
 0x1e1   :  { %v2505_v28 = vpop.f32.mrb[12].mxu0 }
 0x1e2   :  { %v2506_v10 = vadd.f32 %v2505_v28, %v2262_v7  ;;  %v2507_v20 = vpop.f32.mrb[13].mxu0 }
 0x1e3   :  { %v2508_v13 = vadd.f32 %v2507_v20, %v2264_v8  ;;  %v2509_v15 = vpop.f32.mrb[14].mxu0 }
 0x1e4   :  { %2697 = vst [vmem:[%s4746_s3 + $0x60] sm:$0xff] %v2506_v10  ;;  %v2510_v17 = vadd.f32 %v2509_v15, %v2266_v52  ;;  %v2511_v56 = vpop.f32.mrb[15].mxu0 }
 0x1e5   :  { %2698 = vst.msk [vmem:[%s4746_s3 + $0x68] sm:$0xff] %vm2685_vm1, %v2508_v13  ;;  %v2512_v18 = vadd.f32 %v2511_v56, %v2268_v9  ;;  %v2272_v31 = vpop.f32.mrb[16].mxu1 }
 0x1e6   :  { %2699 = vst [vmem:[%s4746_s3 + $0x70] sm:$0xff] %v2510_v17  ;;  %v2274_v19 = vpop.f32.mrb[17].mxu1 }
 0x1e7   :  { %2700 = vst.msk [vmem:[%s4746_s3 + $0x78] sm:$0xff] %vm2685_vm1, %v2512_v18  ;;  %v2276_v24 = vpop.f32.mrb[18].mxu1 }
 0x1e8   :  { %v2278_v21 = vpop.f32.mrb[19].mxu1 }
 0x1e9   :  { %v2515_v23 = vpop.f32.mrb[16].mxu0 }
 0x1ea   :  { %v2516_v25 = vadd.f32 %v2515_v23, %v2272_v31  ;;  %v2517_v60 = vpop.f32.mrb[17].mxu0 }
 0x1eb   :  { %v2518_v26 = vadd.f32 %v2517_v60, %v2274_v19  ;;  %v2519_v34 = vpop.f32.mrb[18].mxu0 }
 0x1ec   :  { %2701 = vst [vmem:[%s4746_s3 + $0x80] sm:$0xff] %v2516_v25  ;;  %v2520_v27 = vadd.f32 %v2519_v34, %v2276_v24  ;;  %v2521_v6 = vpop.f32.mrb[19].mxu0 }
 0x1ed   :  { %2702 = vst.msk [vmem:[%s4746_s3 + $0x88] sm:$0xff] %vm2685_vm1, %v2518_v26  ;;  %v2522_v29 = vadd.f32 %v2521_v6, %v2278_v21  ;;  %v2282_v32 = vpop.f32.mrb[20].mxu1 }
 0x1ee   :  { %2703 = vst [vmem:[%s4746_s3 + $0x90] sm:$0xff] %v2520_v27  ;;  %v2284_v33 = vpop.f32.mrb[21].mxu1 }
 0x1ef   :  { %2704 = vst.msk [vmem:[%s4746_s3 + $0x98] sm:$0xff] %vm2685_vm1, %v2522_v29  ;;  %v2286_v14 = vpop.f32.mrb[22].mxu1 }
 0x1f0   :  { %v2288_v35 = vpop.f32.mrb[23].mxu1 }
 0x1f1   :  { %v2525_v36 = vpop.f32.mrb[20].mxu0 }
 0x1f2   :  { %v2526_v37 = vadd.f32 %v2525_v36, %v2282_v32  ;;  %v2527_v22 = vpop.f32.mrb[21].mxu0 }
 0x1f3   :  { %v2528_v38 = vadd.f32 %v2527_v22, %v2284_v33  ;;  %v2529_v39 = vpop.f32.mrb[22].mxu0 }
 0x1f4   :  { %2705 = vst [vmem:[%s4746_s3 + $0xa0] sm:$0xff] %v2526_v37  ;;  %v2530_v41 = vadd.f32 %v2529_v39, %v2286_v14  ;;  %v2531_v42 = vpop.f32.mrb[23].mxu0 }
 0x1f5   :  { %2706 = vst.msk [vmem:[%s4746_s3 + $0xa8] sm:$0xff] %vm2685_vm1, %v2528_v38  ;;  %v2532_v43 = vadd.f32 %v2531_v42, %v2288_v35  ;;  %v2292_v40 = vpop.f32.mrb[24].mxu1 }
 0x1f6   :  { %2707 = vst [vmem:[%s4746_s3 + $0xb0] sm:$0xff] %v2530_v41  ;;  %v2294_v30 = vpop.f32.mrb[25].mxu1 }
 0x1f7   :  { %2708 = vst.msk [vmem:[%s4746_s3 + $0xb8] sm:$0xff] %vm2685_vm1, %v2532_v43  ;;  %v2296_v3 = vpop.f32.mrb[26].mxu1 }
 0x1f8   :  { %v2298_v44 = vpop.f32.mrb[27].mxu1 }
 0x1f9   :  { %v2535_v46 = vpop.f32.mrb[24].mxu0 }
 0x1fa   :  { %v2536_v47 = vadd.f32 %v2535_v46, %v2292_v40  ;;  %v2537_v50 = vpop.f32.mrb[25].mxu0 }
 0x1fb   :  { %v2538_v49 = vadd.f32 %v2537_v50, %v2294_v30  ;;  %v2539_v51 = vpop.f32.mrb[26].mxu0 }
 0x1fc   :  { %2709 = vst [vmem:[%s4746_s3 + $0xc0] sm:$0xff] %v2536_v47  ;;  %v2540_v53 = vadd.f32 %v2539_v51, %v2296_v3  ;;  %v2541_v16 = vpop.f32.mrb[27].mxu0 }
 0x1fd   :  { %2710 = vst.msk [vmem:[%s4746_s3 + $0xc8] sm:$0xff] %vm2685_vm1, %v2538_v49  ;;  %v2542_v54 = vadd.f32 %v2541_v16, %v2298_v44  ;;  %v2302_v55 = vpop.f32.mrb[28].mxu1 }
 0x1fe   :  { %2711 = vst [vmem:[%s4746_s3 + $0xd0] sm:$0xff] %v2540_v53  ;;  %v2304_v57 = vpop.f32.mrb[29].mxu1 }
 0x1ff   :  { %2712 = vst.msk [vmem:[%s4746_s3 + $0xd8] sm:$0xff] %vm2685_vm1, %v2542_v54  ;;  %v2306_v48 = vpop.f32.mrb[30].mxu1 }
 0x200   :  { %v2308_v58 = vpop.f32.mrb[31].mxu1 }
 0x201   :  { %v2545_v59 = vpop.f32.mrb[28].mxu0 }
 0x202   :  { %v2546_v61 = vadd.f32 %v2545_v59, %v2302_v55  ;;  %v2547_v12 = vpop.f32.mrb[29].mxu0 }
 0x203   :  { %v2548_v62 = vadd.f32 %v2547_v12, %v2304_v57  ;;  %v2549_v63 = vpop.f32.mrb[30].mxu0 }
 0x204   :  { %2713 = vst [vmem:[%s4746_s3 + $0xe0] sm:$0xff] %v2546_v61  ;;  %v2550_v0 = vadd.f32 %v2549_v63, %v2306_v48  ;;  %v2551_v45 = vpop.f32.mrb[31].mxu0 }
 0x205   :  { %2714 = vst.msk [vmem:[%s4746_s3 + $0xe8] sm:$0xff] %vm2685_vm1, %v2548_v62  ;;  %v2552_v1 = vadd.f32 %v2551_v45, %v2308_v58  ;;  %v2312_v2 = vpop.f32.mrb[32].mxu1 }
 0x206   :  { %2715 = vst [vmem:[%s4746_s3 + $0xf0] sm:$0xff] %v2550_v0  ;;  %v2314_v4 = vpop.f32.mrb[33].mxu1 }
 0x207   :  { %2716 = vst.msk [vmem:[%s4746_s3 + $0xf8] sm:$0xff] %vm2685_vm1, %v2552_v1  ;;  %v2316_v11 = vpop.f32.mrb[34].mxu1 }
 0x208   :  { %v2318_v5 = vpop.f32.mrb[35].mxu1 }
 0x209   :  { %v2555_v7 = vpop.f32.mrb[32].mxu0 }
 0x20a   :  { %v2556_v8 = vadd.f32 %v2555_v7, %v2312_v2  ;;  %v2557_v52 = vpop.f32.mrb[33].mxu0 }
 0x20b   :  { %v2558_v9 = vadd.f32 %v2557_v52, %v2314_v4  ;;  %v2559_v28 = vpop.f32.mrb[34].mxu0 }
 0x20c   :  { %2717 = vst [vmem:[%s4746_s3 + $0x100] sm:$0xff] %v2556_v8  ;;  %v2560_v10 = vadd.f32 %v2559_v28, %v2316_v11  ;;  %v2561_v20 = vpop.f32.mrb[35].mxu0 }
 0x20d   :  { %2718 = vst.msk [vmem:[%s4746_s3 + $0x108] sm:$0xff] %vm2685_vm1, %v2558_v9  ;;  %v2562_v13 = vadd.f32 %v2561_v20, %v2318_v5  ;;  %v2322_v15 = vpop.f32.mrb[36].mxu1 }
 0x20e   :  { %2719 = vst [vmem:[%s4746_s3 + $0x110] sm:$0xff] %v2560_v10  ;;  %v2324_v17 = vpop.f32.mrb[37].mxu1 }
 0x20f   :  { %2720 = vst.msk [vmem:[%s4746_s3 + $0x118] sm:$0xff] %vm2685_vm1, %v2562_v13  ;;  %v2326_v56 = vpop.f32.mrb[38].mxu1 }
 0x210   :  { %v2328_v18 = vpop.f32.mrb[39].mxu1 }
 0x211   :  { %v2565_v31 = vpop.f32.mrb[36].mxu0 }
 0x212   :  { %v2566_v19 = vadd.f32 %v2565_v31, %v2322_v15  ;;  %v2567_v24 = vpop.f32.mrb[37].mxu0 }
 0x213   :  { %v2568_v21 = vadd.f32 %v2567_v24, %v2324_v17  ;;  %v2569_v23 = vpop.f32.mrb[38].mxu0 }
 0x214   :  { %2721 = vst [vmem:[%s4746_s3 + $0x120] sm:$0xff] %v2566_v19  ;;  %v2570_v25 = vadd.f32 %v2569_v23, %v2326_v56  ;;  %v2571_v60 = vpop.f32.mrb[39].mxu0 }
 0x215   :  { %2722 = vst.msk [vmem:[%s4746_s3 + $0x128] sm:$0xff] %vm2685_vm1, %v2568_v21  ;;  %v2572_v26 = vadd.f32 %v2571_v60, %v2328_v18  ;;  %v2332_v34 = vpop.f32.mrb[40].mxu1 }
 0x216   :  { %2723 = vst [vmem:[%s4746_s3 + $0x130] sm:$0xff] %v2570_v25  ;;  %v2334_v27 = vpop.f32.mrb[41].mxu1 }
 0x217   :  { %2724 = vst.msk [vmem:[%s4746_s3 + $0x138] sm:$0xff] %vm2685_vm1, %v2572_v26  ;;  %v2336_v6 = vpop.f32.mrb[42].mxu1 }
 0x218   :  { %v2338_v29 = vpop.f32.mrb[43].mxu1 }
 0x219   :  { %v2575_v32 = vpop.f32.mrb[40].mxu0 }
 0x21a   :  { %v2576_v33 = vadd.f32 %v2575_v32, %v2332_v34  ;;  %v2577_v14 = vpop.f32.mrb[41].mxu0 }
 0x21b   :  { %v2578_v35 = vadd.f32 %v2577_v14, %v2334_v27  ;;  %v2579_v36 = vpop.f32.mrb[42].mxu0 }
 0x21c   :  { %2725 = vst [vmem:[%s4746_s3 + $0x140] sm:$0xff] %v2576_v33  ;;  %v2580_v37 = vadd.f32 %v2579_v36, %v2336_v6  ;;  %v2581_v22 = vpop.f32.mrb[43].mxu0 }
 0x21d   :  { %2726 = vst.msk [vmem:[%s4746_s3 + $0x148] sm:$0xff] %vm2685_vm1, %v2578_v35  ;;  %v2582_v38 = vadd.f32 %v2581_v22, %v2338_v29  ;;  %v2342_v39 = vpop.f32.mrb[44].mxu1 }
 0x21e   :  { %2727 = vst [vmem:[%s4746_s3 + $0x150] sm:$0xff] %v2580_v37  ;;  %v2344_v41 = vpop.f32.mrb[45].mxu1 }
 0x21f   :  { %2728 = vst.msk [vmem:[%s4746_s3 + $0x158] sm:$0xff] %vm2685_vm1, %v2582_v38  ;;  %v2346_v42 = vpop.f32.mrb[46].mxu1 }
 0x220   :  { %v2348_v43 = vpop.f32.mrb[47].mxu1 }
 0x221   :  { %v2585_v40 = vpop.f32.mrb[44].mxu0 }
 0x222   :  { %v2586_v30 = vadd.f32 %v2585_v40, %v2342_v39  ;;  %v2587_v3 = vpop.f32.mrb[45].mxu0 }
 0x223   :  { %v2588_v44 = vadd.f32 %v2587_v3, %v2344_v41  ;;  %v2589_v46 = vpop.f32.mrb[46].mxu0 }
 0x224   :  { %2729 = vst [vmem:[%s4746_s3 + $0x160] sm:$0xff] %v2586_v30  ;;  %v2590_v47 = vadd.f32 %v2589_v46, %v2346_v42  ;;  %v2591_v50 = vpop.f32.mrb[47].mxu0 }
 0x225   :  { %2730 = vst.msk [vmem:[%s4746_s3 + $0x168] sm:$0xff] %vm2685_vm1, %v2588_v44  ;;  %v2592_v49 = vadd.f32 %v2591_v50, %v2348_v43  ;;  %v2352_v51 = vpop.f32.mrb[48].mxu1 }
 0x226   :  { %2731 = vst [vmem:[%s4746_s3 + $0x170] sm:$0xff] %v2590_v47  ;;  %v2354_v53 = vpop.f32.mrb[49].mxu1 }
 0x227   :  { %2732 = vst.msk [vmem:[%s4746_s3 + $0x178] sm:$0xff] %vm2685_vm1, %v2592_v49  ;;  %v2356_v16 = vpop.f32.mrb[50].mxu1 }
 0x228   :  { %v2358_v54 = vpop.f32.mrb[51].mxu1 }
 0x229   :  { %v2595_v55 = vpop.f32.mrb[48].mxu0 }
 0x22a   :  { %v2596_v57 = vadd.f32 %v2595_v55, %v2352_v51  ;;  %v2597_v48 = vpop.f32.mrb[49].mxu0 }
 0x22b   :  { %v2598_v58 = vadd.f32 %v2597_v48, %v2354_v53  ;;  %v2599_v59 = vpop.f32.mrb[50].mxu0 }
 0x22c   :  { %2733 = vst [vmem:[%s4746_s3 + $0x180] sm:$0xff] %v2596_v57  ;;  %v2600_v61 = vadd.f32 %v2599_v59, %v2356_v16  ;;  %v2601_v12 = vpop.f32.mrb[51].mxu0 }
 0x22d   :  { %2734 = vst.msk [vmem:[%s4746_s3 + $0x188] sm:$0xff] %vm2685_vm1, %v2598_v58  ;;  %v2602_v62 = vadd.f32 %v2601_v12, %v2358_v54  ;;  %v2362_v63 = vpop.f32.mrb[52].mxu1 }
 0x22e   :  { %2735 = vst [vmem:[%s4746_s3 + $0x190] sm:$0xff] %v2600_v61  ;;  %v2364_v0 = vpop.f32.mrb[53].mxu1 }
 0x22f   :  { %2736 = vst.msk [vmem:[%s4746_s3 + $0x198] sm:$0xff] %vm2685_vm1, %v2602_v62  ;;  %v2366_v45 = vpop.f32.mrb[54].mxu1 }
 0x230   :  { %v2368_v1 = vpop.f32.mrb[55].mxu1 }
 0x231   :  { %v2605_v2 = vpop.f32.mrb[52].mxu0 }
 0x232   :  { %v2606_v4 = vadd.f32 %v2605_v2, %v2362_v63  ;;  %v2607_v11 = vpop.f32.mrb[53].mxu0 }
 0x233   :  { %v2608_v5 = vadd.f32 %v2607_v11, %v2364_v0  ;;  %v2609_v7 = vpop.f32.mrb[54].mxu0 }
 0x234   :  { %2737 = vst [vmem:[%s4746_s3 + $0x1a0] sm:$0xff] %v2606_v4  ;;  %v2610_v8 = vadd.f32 %v2609_v7, %v2366_v45  ;;  %v2611_v52 = vpop.f32.mrb[55].mxu0 }
 0x235   :  { %2738 = vst.msk [vmem:[%s4746_s3 + $0x1a8] sm:$0xff] %vm2685_vm1, %v2608_v5  ;;  %v2612_v9 = vadd.f32 %v2611_v52, %v2368_v1  ;;  %v2372_v28 = vpop.f32.mrb[56].mxu1 }
 0x236   :  { %2739 = vst [vmem:[%s4746_s3 + $0x1b0] sm:$0xff] %v2610_v8  ;;  %v2374_v10 = vpop.f32.mrb[57].mxu1 }
 0x237   :  { %2740 = vst.msk [vmem:[%s4746_s3 + $0x1b8] sm:$0xff] %vm2685_vm1, %v2612_v9  ;;  %v2376_v20 = vpop.f32.mrb[58].mxu1 }
 0x238   :  { %v2378_v13 = vpop.f32.mrb[59].mxu1 }
 0x239   :  { %v2615_v15 = vpop.f32.mrb[56].mxu0 }
 0x23a   :  { %v2616_v17 = vadd.f32 %v2615_v15, %v2372_v28  ;;  %v2617_v56 = vpop.f32.mrb[57].mxu0 }
 0x23b   :  { %v2618_v18 = vadd.f32 %v2617_v56, %v2374_v10  ;;  %v2619_v31 = vpop.f32.mrb[58].mxu0 }
 0x23c   :  { %2741 = vst [vmem:[%s4746_s3 + $0x1c0] sm:$0xff] %v2616_v17  ;;  %v2620_v19 = vadd.f32 %v2619_v31, %v2376_v20  ;;  %v2621_v24 = vpop.f32.mrb[59].mxu0 }
 0x23d   :  { %2742 = vst.msk [vmem:[%s4746_s3 + $0x1c8] sm:$0xff] %vm2685_vm1, %v2618_v18  ;;  %v2622_v21 = vadd.f32 %v2621_v24, %v2378_v13  ;;  %v2382_v23 = vpop.f32.mrb[60].mxu1 }
 0x23e   :  { %2743 = vst [vmem:[%s4746_s3 + $0x1d0] sm:$0xff] %v2620_v19  ;;  %v2384_v25 = vpop.f32.mrb[61].mxu1 }
 0x23f   :  { %2744 = vst.msk [vmem:[%s4746_s3 + $0x1d8] sm:$0xff] %vm2685_vm1, %v2622_v21  ;;  %v2386_v60 = vpop.f32.mrb[62].mxu1 }
 0x240   :  { %v2388_v26 = vpop.f32.mrb[63].mxu1 }
 0x241   :  { %v2625_v34 = vpop.f32.mrb[60].mxu0 }
 0x242   :  { %v2626_v27 = vadd.f32 %v2625_v34, %v2382_v23  ;;  %v2627_v6 = vpop.f32.mrb[61].mxu0 }
 0x243   :  { %v2628_v29 = vadd.f32 %v2627_v6, %v2384_v25  ;;  %v2629_v32 = vpop.f32.mrb[62].mxu0 }
 0x244   :  { %2745 = vst [vmem:[%s4746_s3 + $0x1e0] sm:$0xff] %v2626_v27  ;;  %v2630_v33 = vadd.f32 %v2629_v32, %v2386_v60  ;;  %v2631_v14 = vpop.f32.mrb[63].mxu0 }
 0x245   :  { %2746 = vst.msk [vmem:[%s4746_s3 + $0x1e8] sm:$0xff] %vm2685_vm1, %v2628_v29  ;;  %v2632_v35 = vadd.f32 %v2631_v14, %v2388_v26  ;;  %v2392_v36 = vpop.f32.mrb[64].mxu1 }
 0x246   :  { %2747 = vst [vmem:[%s4746_s3 + $0x1f0] sm:$0xff] %v2630_v33  ;;  %v2394_v37 = vpop.f32.mrb[65].mxu1 }
 0x247   :  { %2748 = vst.msk [vmem:[%s4746_s3 + $0x1f8] sm:$0xff] %vm2685_vm1, %v2632_v35  ;;  %v2396_v22 = vpop.f32.mrb[66].mxu1 }
 0x248   :  { %v2398_v38 = vpop.f32.mrb[67].mxu1 }
 0x249   :  { %v2635_v39 = vpop.f32.mrb[64].mxu0 }
 0x24a   :  { %v2636_v41 = vadd.f32 %v2635_v39, %v2392_v36  ;;  %v2637_v42 = vpop.f32.mrb[65].mxu0 }
 0x24b   :  { %v2638_v43 = vadd.f32 %v2637_v42, %v2394_v37  ;;  %v2639_v40 = vpop.f32.mrb[66].mxu0 }
 0x24c   :  { %2749 = vst [vmem:[%s4746_s3 + $0x200] sm:$0xff] %v2636_v41  ;;  %v2640_v30 = vadd.f32 %v2639_v40, %v2396_v22  ;;  %v2641_v3 = vpop.f32.mrb[67].mxu0 }
 0x24d   :  { %2750 = vst.msk [vmem:[%s4746_s3 + $0x208] sm:$0xff] %vm2685_vm1, %v2638_v43  ;;  %v2642_v44 = vadd.f32 %v2641_v3, %v2398_v38  ;;  %v2402_v46 = vpop.f32.mrb[68].mxu1 }
 0x24e   :  { %2751 = vst [vmem:[%s4746_s3 + $0x210] sm:$0xff] %v2640_v30  ;;  %v2404_v47 = vpop.f32.mrb[69].mxu1 }
 0x24f   :  { %2752 = vst.msk [vmem:[%s4746_s3 + $0x218] sm:$0xff] %vm2685_vm1, %v2642_v44  ;;  %v2406_v50 = vpop.f32.mrb[70].mxu1 }
 0x250   :  { %v2408_v49 = vpop.f32.mrb[71].mxu1 }
 0x251   :  { %v2645_v51 = vpop.f32.mrb[68].mxu0 }
 0x252   :  { %v2646_v53 = vadd.f32 %v2645_v51, %v2402_v46  ;;  %v2647_v16 = vpop.f32.mrb[69].mxu0 }
 0x253   :  { %v2648_v54 = vadd.f32 %v2647_v16, %v2404_v47  ;;  %v2649_v55 = vpop.f32.mrb[70].mxu0 }
 0x254   :  { %2753 = vst [vmem:[%s4746_s3 + $0x220] sm:$0xff] %v2646_v53  ;;  %v2650_v57 = vadd.f32 %v2649_v55, %v2406_v50  ;;  %v2651_v48 = vpop.f32.mrb[71].mxu0 }
 0x255   :  { %2754 = vst.msk [vmem:[%s4746_s3 + $0x228] sm:$0xff] %vm2685_vm1, %v2648_v54  ;;  %v2652_v58 = vadd.f32 %v2651_v48, %v2408_v49  ;;  %v2412_v59 = vpop.f32.mrb[72].mxu1 }
 0x256   :  { %2755 = vst [vmem:[%s4746_s3 + $0x230] sm:$0xff] %v2650_v57  ;;  %v2414_v61 = vpop.f32.mrb[73].mxu1 }
 0x257   :  { %2756 = vst.msk [vmem:[%s4746_s3 + $0x238] sm:$0xff] %vm2685_vm1, %v2652_v58  ;;  %v2416_v12 = vpop.f32.mrb[74].mxu1 }
 0x258   :  { %v2418_v62 = vpop.f32.mrb[75].mxu1 }
 0x259   :  { %v2655_v63 = vpop.f32.mrb[72].mxu0 }
 0x25a   :  { %v2656_v0 = vadd.f32 %v2655_v63, %v2412_v59  ;;  %v2657_v45 = vpop.f32.mrb[73].mxu0 }
 0x25b   :  { %v2658_v1 = vadd.f32 %v2657_v45, %v2414_v61  ;;  %v2659_v2 = vpop.f32.mrb[74].mxu0 }
 0x25c   :  { %2757 = vst [vmem:[%s4746_s3 + $0x240] sm:$0xff] %v2656_v0  ;;  %v2660_v4 = vadd.f32 %v2659_v2, %v2416_v12  ;;  %v2661_v11 = vpop.f32.mrb[75].mxu0 }
 0x25d   :  { %2758 = vst.msk [vmem:[%s4746_s3 + $0x248] sm:$0xff] %vm2685_vm1, %v2658_v1  ;;  %v2662_v5 = vadd.f32 %v2661_v11, %v2418_v62  ;;  %v2422_v7 = vpop.f32.mrb[76].mxu1 }
 0x25e   :  { %2759 = vst [vmem:[%s4746_s3 + $0x250] sm:$0xff] %v2660_v4  ;;  %v2424_v8 = vpop.f32.mrb[77].mxu1 }
 0x25f   :  { %2760 = vst.msk [vmem:[%s4746_s3 + $0x258] sm:$0xff] %vm2685_vm1, %v2662_v5  ;;  %v2426_v52 = vpop.f32.mrb[78].mxu1 }
 0x260   :  { %v2428_v9 = vpop.f32.mrb[79].mxu1 }
 0x261   :  { %v2665_v28 = vpop.f32.mrb[76].mxu0 }
 0x262   :  { %v2666_v10 = vadd.f32 %v2665_v28, %v2422_v7  ;;  %v2667_v20 = vpop.f32.mrb[77].mxu0 }
 0x263   :  { %v2668_v13 = vadd.f32 %v2667_v20, %v2424_v8  ;;  %v2669_v15 = vpop.f32.mrb[78].mxu0 }
 0x264   :  { %2761 = vst [vmem:[%s4746_s3 + $0x260] sm:$0xff] %v2666_v10  ;;  %v2670_v17 = vadd.f32 %v2669_v15, %v2426_v52  ;;  %v2671_v56 = vpop.f32.mrb[79].mxu0 }
 0x265   :  { %2762 = vst.msk [vmem:[%s4746_s3 + $0x268] sm:$0xff] %vm2685_vm1, %v2668_v13  ;;  %v2672_v18 = vadd.f32 %v2671_v56, %v2428_v9  ;;  %v2432_v31 = vpop.f32.mrb[80].mxu1 }
 0x266   :  { %2763 = vst [vmem:[%s4746_s3 + $0x270] sm:$0xff] %v2670_v17  ;;  %v2434_v19 = vpop.f32.mrb[81].mxu1 }
 0x267   :  { %2764 = vst.msk [vmem:[%s4746_s3 + $0x278] sm:$0xff] %vm2685_vm1, %v2672_v18  ;;  %v2436_v24 = vpop.f32.mrb[82].mxu1 }
 0x268   :  { %v2438_v21 = vpop.f32.mrb[83].mxu1 }
 0x269   :  { %v2675_v23 = vpop.f32.mrb[80].mxu0 }
 0x26a   :  { %v2676_v25 = vadd.f32 %v2675_v23, %v2432_v31  ;;  %v2677_v60 = vpop.f32.mrb[81].mxu0 }
 0x26b   :  { %v2678_v26 = vadd.f32 %v2677_v60, %v2434_v19  ;;  %v2679_v34 = vpop.f32.mrb[82].mxu0 }
 0x26c   :  { %2765 = vst [vmem:[%s4746_s3 + $0x280] sm:$0xff] %v2676_v25  ;;  %v2680_v27 = vadd.f32 %v2679_v34, %v2436_v24  ;;  %v2681_v6 = vpop.f32.mrb[83].mxu0 }
 0x26d   :  { %2766 = vst.msk [vmem:[%s4746_s3 + $0x288] sm:$0xff] %vm2685_vm1, %v2678_v26  ;;  %v2682_v29 = vadd.f32 %v2681_v6, %v2438_v21 }
 0x26e   :  { %2767 = vst [vmem:[%s4746_s3 + $0x290] sm:$0xff] %v2680_v27 }
 0x26f   :  { %2768 = vst.msk [vmem:[%s4746_s3 + $0x298] sm:$0xff] %vm2685_vm1, %v2682_v29 }

</bundles_post_ra>
